<compile_context>
chip_gen: v7x
topology: tpu7x:2x2x1
jax: 0.10.0
libtpu: 0.0.40
codegen_flags: <defaults>
</compile_context>

<pallas_src>
import math

import jax
import jax.numpy as jnp
from jax.experimental import pallas as pl
from jax.experimental.pallas import tpu as pltpu


def _make_encoder_layer_kernel(output_attention):
    """Build the per-(batch-block, query-tile) encoder-layer kernel."""

    def kernel(x_ref, wq_ref, wk_ref, wv_ref, wo_ref,
               w1_ref, b1_ref, w2_ref, vec_ref, *rest):
        # rest = (out_ref[, attn_ref], k_scratch, v_scratch)
        if output_attention:
            out_ref, attn_ref, k_ref, v_ref = rest
        else:
            out_ref, k_ref, v_ref = rest
            attn_ref = None

        BB, L, D = x_ref.shape
        BQ = out_ref.shape[1]
        qi = pl.program_id(1)

        # --- cache K/V for this batch block once (query axis iterates fastest)
        @pl.when(qi == 0)
        def _():
            x_all = x_ref[...].reshape(BB * L, D).astype(jnp.bfloat16)
            k = jnp.dot(x_all, wk_ref[...], preferred_element_type=jnp.float32)
            v = jnp.dot(x_all, wv_ref[...], preferred_element_type=jnp.float32)
            k_ref[...] = k.astype(jnp.bfloat16).reshape(BB, L, D)
            v_ref[...] = v.astype(jnp.bfloat16).reshape(BB, L, D)

        # --- query tile rows (slice from the resident full-sequence x block)
        q_start = pl.multiple_of(qi * BQ, BQ)
        xq = x_ref[:, pl.ds(q_start, BQ), :].astype(jnp.float32)    # (BB, BQ, D)
        xq2 = xq.reshape(BB * BQ, D)

        # Q projection (1/sqrt(D) softmax scale already folded into wq).
        q = jnp.dot(xq2.astype(jnp.bfloat16), wq_ref[...],
                    preferred_element_type=jnp.float32)
        q = q.astype(jnp.bfloat16).reshape(BB, BQ, D)

        # --- attention against cached K/V (contract last dims, no k.T) -------
        s = jnp.einsum('bqd,bkd->bqk', q, k_ref[...],
                       preferred_element_type=jnp.float32)          # (BB, BQ, L)
        m = jnp.max(s, axis=-1, keepdims=True)
        p = jnp.exp(s - m)
        denom = jnp.sum(p, axis=-1, keepdims=True)
        attn = p * pl.reciprocal(denom, approx=True)                # (BB, BQ, L)

        ctx = jnp.einsum('bqk,bkd->bqd', attn.astype(jnp.bfloat16), v_ref[...],
                         preferred_element_type=jnp.float32)        # (BB, BQ, D)
        ctx2 = jnp.dot(ctx.reshape(BB * BQ, D).astype(jnp.bfloat16), wo_ref[...],
                       preferred_element_type=jnp.float32)          # (BB*BQ, D)

        vecs = vec_ref[...]                                          # (5, D) f32
        b2 = vecs[0:1, :]
        g1 = vecs[1:2, :]
        be1 = vecs[2:3, :]
        g2 = vecs[3:4, :]
        be2 = vecs[4:5, :]

        # --- residual + LayerNorm 1 (one-pass: var = E[y^2] - mean^2) --------
        y = xq2 + ctx2
        mu = jnp.mean(y, axis=-1, keepdims=True)
        var = jnp.mean(y * y, axis=-1, keepdims=True) - mu * mu
        y = (y - mu) * jax.lax.rsqrt(var + 1e-5) * g1 + be1

        # --- feed-forward (bf16 MXU operands, f32 accumulate & elementwise) --
        h = jnp.dot(y.astype(jnp.bfloat16), w1_ref[...],
                    preferred_element_type=jnp.float32) + b1_ref[...]
        h = jnp.maximum(h, 0.0)
        f = jnp.dot(h.astype(jnp.bfloat16), w2_ref[...],
                    preferred_element_type=jnp.float32) + b2

        # --- residual + LayerNorm 2 ------------------------------------------
        z = y + f
        mu2 = jnp.mean(z, axis=-1, keepdims=True)
        var2 = jnp.mean(z * z, axis=-1, keepdims=True) - mu2 * mu2
        z = (z - mu2) * jax.lax.rsqrt(var2 + 1e-5) * g2 + be2

        out_ref[...] = z.reshape(BB, BQ, D).astype(out_ref.dtype)
        if attn_ref is not None:
            attn_ref[...] = attn.astype(attn_ref.dtype)

    return kernel


def _pick_block_q(L, requested=None):
    """Query-tile rows: divide L, be a multiple of 8 (sublane) or equal L."""
    if (requested is not None and requested <= L and L % requested == 0
            and (requested % 8 == 0 or requested == L)):
        return requested
    for c in (256, 128, 64, 32, 16, 8):   # MXU-friendly row counts
        if L % c == 0:
            return c
    return L


def _vmem_limit_bytes(block_b, block_q, L, D, Dff):
    """Explicit scoped-VMEM budget from the chosen tiles (2x for double-buffer)."""
    bf16, f32 = 2, 4
    weights = (4 * D * D + 2 * D * Dff) * bf16 + (Dff + 5 * D) * f32
    x_blk = block_b * L * D * f32
    out_blk = block_b * block_q * D * f32 + block_b * block_q * L * bf16
    kv_scratch = 2 * block_b * L * D * bf16
    live = 4 * block_b * block_q * max(L, Dff) * f32   # headroom for intermediates
    est = 2 * (weights + x_blk + out_blk) + kv_scratch + live
    # Cap below v7x's 64 MiB physical VMEM; v5e/v6e have 128 MiB so this is safe
    # on every generation.  Floor avoids starving the compiler at tiny shapes.
    return int(min(max(est, 16 << 20), 48 << 20))


def encoder_layer(x, params, *, block_b=None, block_q=None,
                  output_attention=True,
                  out_dtype=jnp.float32, attn_dtype=jnp.bfloat16):
    """Run one encoder layer on x of shape (B, L, D) via a single pallas_call."""
    B, L, D = x.shape
    Dff = params["w1"].shape[-1]

    if block_b is None or B % block_b != 0:
        block_b = 1 if B > 1 else B          # >=2 batch steps -> v7x 2-TC sharding
    block_q = _pick_block_q(L, block_q)
    grid = (B // block_b, L // block_q)

    # Grid-invariant weight/vector blocks (DMA'd once, reused every step).
    # TODO(synk): add pipeline_mode=pl.Buffered(1) for these once verified to
    # lower cleanly on all target generations (saves their second VMEM buffer).
    const2d = lambda shape: pl.BlockSpec(shape, lambda bi, qi: (0, 0))

    in_specs = [
        # Full-sequence x per batch block: resident across the query axis,
        # used both for the cached K/V projection and the per-tile query rows.
        pl.BlockSpec((block_b, L, D), lambda bi, qi: (bi, 0, 0)),
        const2d((D, D)),      # wq (softmax scale folded in), bf16
        const2d((D, D)),      # wk, bf16
        const2d((D, D)),      # wv, bf16
        const2d((D, D)),      # wo, bf16
        const2d((D, Dff)),    # w1, bf16
        const2d((1, Dff)),    # b1, f32
        const2d((Dff, D)),    # w2, bf16
        const2d((5, D)),      # packed [b2; gamma1; beta1; gamma2; beta2], f32
    ]

    out_spec_x = pl.BlockSpec((block_b, block_q, D), lambda bi, qi: (bi, qi, 0))
    out_shape_x = jax.ShapeDtypeStruct((B, L, D), out_dtype)
    if output_attention:
        out_specs = [out_spec_x,
                     pl.BlockSpec((block_b, block_q, L), lambda bi, qi: (bi, qi, 0))]
        out_shapes = (out_shape_x,
                      jax.ShapeDtypeStruct((B, L, L), attn_dtype))
    else:
        out_specs = out_spec_x
        out_shapes = out_shape_x

    scratch_shapes = [
        pltpu.VMEM((block_b, L, D), jnp.bfloat16),   # cached K
        pltpu.VMEM((block_b, L, D), jnp.bfloat16),   # cached V
    ]

    grid_spec = pltpu.PrefetchScalarGridSpec(
        num_scalar_prefetch=0,
        grid=grid,
        in_specs=in_specs,
        out_specs=out_specs,
        scratch_shapes=scratch_shapes,
    )

    result = pl.pallas_call(
        _make_encoder_layer_kernel(output_attention),
        out_shape=out_shapes,
        grid_spec=grid_spec,
        compiler_params=pltpu.CompilerParams(
            # batch blocks are independent (megacore-parallel on v7x);
            # query axis carries the cached K/V scratch -> arbitrary.
            dimension_semantics=("parallel", "arbitrary"),
            vmem_limit_bytes=_vmem_limit_bytes(block_b, block_q, L, D, Dff)),
    )(x, params["wq"], params["wk"], params["wv"], params["wo"],
      params["w1"], params["b1"], params["w2"], params["vec"])

    if output_attention:
        return result
    return result, None


def make_encoder_params(key, d_model, d_ff):
    """Deterministic per-encoder parameter init (bf16 MXU weights, f32 vectors)."""
    ks = jax.random.split(key, 6)
    init = lambda k, shape: (0.02 * jax.random.normal(k, shape)).astype(jnp.float32)
    scale = 1.0 / math.sqrt(float(d_model))
    # Fold the 1/sqrt(D) softmax scale into the Q projection (done once, offline).
    wq = (init(ks[0], (d_model, d_model)) * scale).astype(jnp.bfloat16)
    # Packed small vectors: [b2; gamma1; beta1; gamma2; beta2]  -> (5, D)
    vec = jnp.stack([
        jnp.zeros((d_model,), jnp.float32),   # b2
        jnp.ones((d_model,), jnp.float32),    # gamma1
        jnp.zeros((d_model,), jnp.float32),   # beta1
        jnp.ones((d_model,), jnp.float32),    # gamma2
        jnp.zeros((d_model,), jnp.float32),   # beta2
    ], axis=0)
    # TODO(synk): fp8 weights (with per-channel scales) for v7x's fp8 MXU path.
    return {
        "wq": wq,
        "wk": init(ks[1], (d_model, d_model)).astype(jnp.bfloat16),
        "wv": init(ks[2], (d_model, d_model)).astype(jnp.bfloat16),
        "wo": init(ks[3], (d_model, d_model)).astype(jnp.bfloat16),
        "w1": init(ks[4], (d_model, d_ff)).astype(jnp.bfloat16),
        "b1": jnp.zeros((1, d_ff), jnp.float32),
        "w2": init(ks[5], (d_ff, d_model)).astype(jnp.bfloat16),
        "vec": vec,
    }


def encoder_stack_forward(x, encoder_params_list, inp_lens, attn_mask=None,
                          *, block_b=None, block_q=None):
    """JAX/Pallas equivalent of EncoderStack.forward.

    x: (B, L, D). For each (i_len, encoder):
        inp_len = L // 2**i_len
        x_s, attn = encoder(x[:, -inp_len:, :])
    Returns (concat(x_s list, axis=-2), [attn, ...]).

    attn_mask is accepted for API parity; note the reference EncoderStack.forward
    also never forwards it to the encoders, so it is (faithfully) unused here.
    """
    # TODO(synk): fuse the per-encoder pallas_calls into one kernel (pad slices
    # to a common L, pass per-encoder lengths/offsets via scalar prefetch) so
    # the small encoders' work hides under the big one's DMA.
    del attn_mask
    L = x.shape[1]
    x_stack = []
    attns = []
    for i_len, params in zip(inp_lens, encoder_params_list):
        inp_len = L // (2 ** i_len)
        x_slice = x[:, -inp_len:, :]
        x_s, attn = encoder_layer(x_slice, params,
                                  block_b=block_b, block_q=block_q)
        x_stack.append(x_s)
        attns.append(attn)
    x_stack = jnp.concatenate(x_stack, axis=-2)
    return x_stack, attns


if __name__ == "__main__":
    B, L, D, Dff = 2, 16, 32, 64
    inp_lens = [0, 1]          # -> slice lengths 16 and 8; output seq = 24

    root = jax.random.PRNGKey(0)
    k_x, k_e = jax.random.split(root)
    x = jax.random.normal(k_x, (B, L, D), dtype=jnp.float32)

    enc_keys = jax.random.split(k_e, len(inp_lens))
    encoder_params_list = [make_encoder_params(k, D, Dff) for k in enc_keys]

    # Whole stack in one jit region; block_b=1 / block_q=8 exercise both the
    # parallel batch axis (2 steps, v7x 2-TC sharding) and query tiling
    # (2 query tiles for the first encoder, cached K/V reused across them).
    @jax.jit
    def fwd(x, params_list):
        return encoder_stack_forward(x, params_list, inp_lens,
                                     block_b=1, block_q=8)

    x_stack, attns = fwd(x, encoder_params_list)
    x_stack = jax.block_until_ready(x_stack)
    attns = [jax.block_until_ready(a) for a in attns]

    assert x_stack.shape == (B, L + L // 2, D), x_stack.shape
    assert attns[0].shape == (B, L, L), attns[0].shape
    assert attns[1].shape == (B, L // 2, L // 2), attns[1].shape
    assert bool(jnp.all(jnp.isfinite(x_stack)))
    # attention rows must sum to ~1 (bf16 storage + approx reciprocal)
    row_sums = jnp.sum(attns[0].astype(jnp.float32), axis=-1)
    assert bool(jnp.all(jnp.abs(row_sums - 1.0) < 2e-2))

    print("KERNEL_OK")
</pallas_src>

<mosaic_0001>
module attributes {stable_mosaic.version = 11 : i64} {
  func.func @kernel(%arg0: i32, %arg1: i32, %arg2: memref<1x8x32xf32, #tpu.memory_space<vmem>>, %arg3: memref<32x32xbf16, #tpu.memory_space<vmem>>, %arg4: memref<32x32xbf16, #tpu.memory_space<vmem>>, %arg5: memref<32x32xbf16, #tpu.memory_space<vmem>>, %arg6: memref<32x32xbf16, #tpu.memory_space<vmem>>, %arg7: memref<32x64xbf16, #tpu.memory_space<vmem>>, %arg8: memref<1x64xf32, #tpu.memory_space<vmem>>, %arg9: memref<64x32xbf16, #tpu.memory_space<vmem>>, %arg10: memref<5x32xf32, #tpu.memory_space<vmem>>, %arg11: memref<1x8x32xf32, #tpu.memory_space<vmem>>, %arg12: memref<1x8x8xbf16, #tpu.memory_space<vmem>>, %arg13: memref<1x8x32xbf16, #tpu.memory_space<vmem>>, %arg14: memref<1x8x32xbf16, #tpu.memory_space<vmem>>) attributes {dimension_semantics = [#tpu.dimension_semantics<parallel>, #tpu.dimension_semantics<arbitrary>], iteration_bounds = array<i64: 2, 1>, scalar_prefetch = 0 : i64, scratch_operands = 2 : i64, tpu.core_type = #tpu.core_type<tc>, window_params = [{transform_indices = @transform_0, window_bounds = array<i64: 1, 8, 32>}, {pipeline_mode = #tpu.pipeline_mode<synchronous>, transform_indices = @transform_1, window_bounds = array<i64: 32, 32>}, {pipeline_mode = #tpu.pipeline_mode<synchronous>, transform_indices = @transform_2, window_bounds = array<i64: 32, 32>}, {pipeline_mode = #tpu.pipeline_mode<synchronous>, transform_indices = @transform_3, window_bounds = array<i64: 32, 32>}, {pipeline_mode = #tpu.pipeline_mode<synchronous>, transform_indices = @transform_4, window_bounds = array<i64: 32, 32>}, {pipeline_mode = #tpu.pipeline_mode<synchronous>, transform_indices = @transform_5, window_bounds = array<i64: 32, 64>}, {pipeline_mode = #tpu.pipeline_mode<synchronous>, transform_indices = @transform_6, window_bounds = array<i64: 1, 64>}, {pipeline_mode = #tpu.pipeline_mode<synchronous>, transform_indices = @transform_7, window_bounds = array<i64: 64, 32>}, {pipeline_mode = #tpu.pipeline_mode<synchronous>, transform_indices = @transform_8, window_bounds = array<i64: 5, 32>}, {transform_indices = @transform_9, window_bounds = array<i64: 1, 8, 32>}, {transform_indices = @transform_10, window_bounds = array<i64: 1, 8, 8>}]} {
    %c0_i32 = arith.constant 0 : i32
    %0 = arith.cmpi eq, %arg1, %c0_i32 : i32
    %1 = arith.extui %0 : i1 to i32
    %c0_i32_0 = arith.constant 0 : i32
    %2 = arith.cmpi ne, %1, %c0_i32_0 : i32
    scf.if %2 {
      %c0_44 = arith.constant 0 : index
      %c0_45 = arith.constant 0 : index
      %c0_46 = arith.constant 0 : index
      %101 = vector.load %arg2[%c0_44, %c0_45, %c0_46] : memref<1x8x32xf32, #tpu.memory_space<vmem>>, vector<1x8x32xf32>
      %102 = vector.shape_cast %101 : vector<1x8x32xf32> to vector<8x32xf32>
      %103 = arith.truncf %102 : vector<8x32xf32> to vector<8x32xbf16>
      %c0_47 = arith.constant 0 : index
      %c0_48 = arith.constant 0 : index
      %104 = vector.load %arg4[%c0_47, %c0_48] : memref<32x32xbf16, #tpu.memory_space<vmem>>, vector<32x32xbf16>
      %cst_49 = arith.constant dense<0.000000e+00> : vector<8x32xf32>
      %105 = tpu.matmul %103, %104, %cst_49 {dimension_numbers = #tpu.dot_dimension_numbers<[1], [0], [0], [1], [0, 0, 1, 1], [], []>} : vector<8x32xbf16>, vector<32x32xbf16>, vector<8x32xf32> -> vector<8x32xf32>
      %c0_50 = arith.constant 0 : index
      %c0_51 = arith.constant 0 : index
      %106 = vector.load %arg5[%c0_50, %c0_51] : memref<32x32xbf16, #tpu.memory_space<vmem>>, vector<32x32xbf16>
      %cst_52 = arith.constant dense<0.000000e+00> : vector<8x32xf32>
      %107 = tpu.matmul %103, %106, %cst_52 {dimension_numbers = #tpu.dot_dimension_numbers<[1], [0], [0], [1], [0, 0, 1, 1], [], []>} : vector<8x32xbf16>, vector<32x32xbf16>, vector<8x32xf32> -> vector<8x32xf32>
      %108 = arith.truncf %105 : vector<8x32xf32> to vector<8x32xbf16>
      %109 = vector.shape_cast %108 : vector<8x32xbf16> to vector<1x8x32xbf16>
      %c0_53 = arith.constant 0 : index
      %c0_54 = arith.constant 0 : index
      %c0_55 = arith.constant 0 : index
      %110 = vector.load %arg13[%c0_53, %c0_54, %c0_55] : memref<1x8x32xbf16, #tpu.memory_space<vmem>>, vector<1x8x32xbf16>
      tpu.vector_store %arg13[%c0_53, %c0_54, %c0_55], %109 {strides = array<i32>} : memref<1x8x32xbf16, #tpu.memory_space<vmem>>, vector<1x8x32xbf16>,
      %111 = arith.truncf %107 : vector<8x32xf32> to vector<8x32xbf16>
      %112 = vector.shape_cast %111 : vector<8x32xbf16> to vector<1x8x32xbf16>
      %c0_56 = arith.constant 0 : index
      %c0_57 = arith.constant 0 : index
      %c0_58 = arith.constant 0 : index
      %113 = vector.load %arg14[%c0_56, %c0_57, %c0_58] : memref<1x8x32xbf16, #tpu.memory_space<vmem>>, vector<1x8x32xbf16>
      tpu.vector_store %arg14[%c0_56, %c0_57, %c0_58], %112 {strides = array<i32>} : memref<1x8x32xbf16, #tpu.memory_space<vmem>>, vector<1x8x32xbf16>,
    } else {
    }
    %c8_i32 = arith.constant 8 : i32
    %3 = arith.muli %arg1, %c8_i32 : i32
    %4 = tpu.assume_multiple %3, 8 : i32
    %c0 = arith.constant 0 : index
    %5 = arith.index_cast %4 : i32 to index
    %c0_1 = arith.constant 0 : index
    %6 = vector.load %arg2[%c0, %5, %c0_1] : memref<1x8x32xf32, #tpu.memory_space<vmem>>, vector<1x8x32xf32>
    %7 = vector.shape_cast %6 : vector<1x8x32xf32> to vector<8x32xf32>
    %8 = arith.truncf %7 : vector<8x32xf32> to vector<8x32xbf16>
    %c0_2 = arith.constant 0 : index
    %c0_3 = arith.constant 0 : index
    %9 = vector.load %arg3[%c0_2, %c0_3] : memref<32x32xbf16, #tpu.memory_space<vmem>>, vector<32x32xbf16>
    %cst = arith.constant dense<0.000000e+00> : vector<8x32xf32>
    %10 = tpu.matmul %8, %9, %cst {dimension_numbers = #tpu.dot_dimension_numbers<[1], [0], [0], [1], [0, 0, 1, 1], [], []>} : vector<8x32xbf16>, vector<32x32xbf16>, vector<8x32xf32> -> vector<8x32xf32>
    %11 = arith.truncf %10 : vector<8x32xf32> to vector<8x32xbf16>
    %12 = vector.shape_cast %11 : vector<8x32xbf16> to vector<1x8x32xbf16>
    %c0_4 = arith.constant 0 : index
    %c0_5 = arith.constant 0 : index
    %c0_6 = arith.constant 0 : index
    %13 = vector.load %arg13[%c0_4, %c0_5, %c0_6] : memref<1x8x32xbf16, #tpu.memory_space<vmem>>, vector<1x8x32xbf16>
    "tpu.trace_start"() <{level = 10 : i32, message = "bqd,bkd->bqk"}> : () -> ()
    %cst_7 = arith.constant dense<0.000000e+00> : vector<1x8x8xf32>
    %14 = tpu.matmul %12, %13, %cst_7 {dimension_numbers = #tpu.dot_dimension_numbers<[2], [2], [1], [1], [0, 0, 0, 1, 1, 1], [0], [0]>} : vector<1x8x32xbf16>, vector<1x8x32xbf16>, vector<1x8x8xf32> -> vector<1x8x8xf32>
    "tpu.trace_stop"() : () -> ()
    %cst_8 = arith.constant dense<0xFF800000> : vector<1x8xf32>
    %15 = vector.multi_reduction <maximumf>, %14, %cst_8 [2] : vector<1x8x8xf32> to vector<1x8xf32>
    %16 = vector.shape_cast %15 : vector<1x8xf32> to vector<1x8x1xf32>
    %17 = vector.broadcast %16 : vector<1x8x1xf32> to vector<1x8x8xf32>
    %18 = arith.subf %14, %17 : vector<1x8x8xf32>
    %19 = math.exp %18 : vector<1x8x8xf32>
    %cst_9 = arith.constant dense<0.000000e+00> : vector<1x8xf32>
    %20 = vector.multi_reduction <add>, %19, %cst_9 [2] : vector<1x8x8xf32> to vector<1x8xf32>
    %21 = vector.shape_cast %20 : vector<1x8xf32> to vector<1x8x1xf32>
    %22 = tpu.reciprocal %21 {approx = true} : vector<1x8x1xf32> -> vector<1x8x1xf32>
    %23 = vector.broadcast %22 : vector<1x8x1xf32> to vector<1x8x8xf32>
    %24 = arith.mulf %19, %23 : vector<1x8x8xf32>
    %25 = arith.truncf %24 : vector<1x8x8xf32> to vector<1x8x8xbf16>
    %c0_10 = arith.constant 0 : index
    %c0_11 = arith.constant 0 : index
    %c0_12 = arith.constant 0 : index
    %26 = vector.load %arg14[%c0_10, %c0_11, %c0_12] : memref<1x8x32xbf16, #tpu.memory_space<vmem>>, vector<1x8x32xbf16>
    "tpu.trace_start"() <{level = 10 : i32, message = "bqk,bkd->bqd"}> : () -> ()
    %cst_13 = arith.constant dense<0.000000e+00> : vector<1x8x32xf32>
    %27 = tpu.matmul %25, %26, %cst_13 {dimension_numbers = #tpu.dot_dimension_numbers<[2], [1], [1], [2], [0, 0, 0, 1, 1, 2], [0], [0]>} : vector<1x8x8xbf16>, vector<1x8x32xbf16>, vector<1x8x32xf32> -> vector<1x8x32xf32>
    "tpu.trace_stop"() : () -> ()
    %28 = vector.shape_cast %27 : vector<1x8x32xf32> to vector<8x32xf32>
    %29 = arith.truncf %28 : vector<8x32xf32> to vector<8x32xbf16>
    %c0_14 = arith.constant 0 : index
    %c0_15 = arith.constant 0 : index
    %30 = vector.load %arg6[%c0_14, %c0_15] : memref<32x32xbf16, #tpu.memory_space<vmem>>, vector<32x32xbf16>
    %cst_16 = arith.constant dense<0.000000e+00> : vector<8x32xf32>
    %31 = tpu.matmul %29, %30, %cst_16 {dimension_numbers = #tpu.dot_dimension_numbers<[1], [0], [0], [1], [0, 0, 1, 1], [], []>} : vector<8x32xbf16>, vector<32x32xbf16>, vector<8x32xf32> -> vector<8x32xf32>
    %c0_17 = arith.constant 0 : index
    %c0_18 = arith.constant 0 : index
    %32 = vector.load %arg10[%c0_17, %c0_18] : memref<5x32xf32, #tpu.memory_space<vmem>>, vector<5x32xf32>
    %33 = vector.extract_strided_slice %32 {offsets = [0, 0], sizes = [1, 32], strides = [1, 1]} : vector<5x32xf32> to vector<1x32xf32>
    %34 = vector.extract_strided_slice %32 {offsets = [1, 0], sizes = [1, 32], strides = [1, 1]} : vector<5x32xf32> to vector<1x32xf32>
    %35 = vector.extract_strided_slice %32 {offsets = [2, 0], sizes = [1, 32], strides = [1, 1]} : vector<5x32xf32> to vector<1x32xf32>
    %36 = vector.extract_strided_slice %32 {offsets = [3, 0], sizes = [1, 32], strides = [1, 1]} : vector<5x32xf32> to vector<1x32xf32>
    %37 = vector.extract_strided_slice %32 {offsets = [4, 0], sizes = [1, 32], strides = [1, 1]} : vector<5x32xf32> to vector<1x32xf32>
    %38 = arith.addf %7, %31 : vector<8x32xf32>
    %cst_19 = arith.constant dense<0.000000e+00> : vector<8xf32>
    %39 = vector.multi_reduction <add>, %38, %cst_19 [1] : vector<8x32xf32> to vector<8xf32>
    %40 = vector.shape_cast %39 : vector<8xf32> to vector<8x1xf32>
    %cst_20 = arith.constant 3.200000e+01 : f32
    %41 = vector.broadcast %cst_20 : f32 to vector<8x1xf32>
    %42 = arith.divf %40, %41 : vector<8x1xf32>
    %43 = arith.mulf %38, %38 : vector<8x32xf32>
    %cst_21 = arith.constant dense<0.000000e+00> : vector<8xf32>
    %44 = vector.multi_reduction <add>, %43, %cst_21 [1] : vector<8x32xf32> to vector<8xf32>
    %45 = vector.shape_cast %44 : vector<8xf32> to vector<8x1xf32>
    %cst_22 = arith.constant 3.200000e+01 : f32
    %46 = vector.broadcast %cst_22 : f32 to vector<8x1xf32>
    %47 = arith.divf %45, %46 : vector<8x1xf32>
    %48 = arith.mulf %42, %42 : vector<8x1xf32>
    %49 = arith.subf %47, %48 : vector<8x1xf32>
    %50 = vector.broadcast %42 : vector<8x1xf32> to vector<8x32xf32>
    %51 = arith.subf %38, %50 : vector<8x32xf32>
    %cst_23 = arith.constant 9.99999974E-6 : f32
    %52 = vector.broadcast %cst_23 : f32 to vector<8x1xf32>
    %53 = arith.addf %49, %52 : vector<8x1xf32>
    %54 = math.rsqrt %53 : vector<8x1xf32>
    %55 = vector.broadcast %54 : vector<8x1xf32> to vector<8x32xf32>
    %56 = arith.mulf %51, %55 : vector<8x32xf32>
    %57 = vector.broadcast %34 : vector<1x32xf32> to vector<8x32xf32>
    %58 = arith.mulf %56, %57 : vector<8x32xf32>
    %59 = vector.broadcast %35 : vector<1x32xf32> to vector<8x32xf32>
    %60 = arith.addf %58, %59 : vector<8x32xf32>
    %61 = arith.truncf %60 : vector<8x32xf32> to vector<8x32xbf16>
    %c0_24 = arith.constant 0 : index
    %c0_25 = arith.constant 0 : index
    %62 = vector.load %arg7[%c0_24, %c0_25] : memref<32x64xbf16, #tpu.memory_space<vmem>>, vector<32x64xbf16>
    %cst_26 = arith.constant dense<0.000000e+00> : vector<8x64xf32>
    %63 = tpu.matmul %61, %62, %cst_26 {dimension_numbers = #tpu.dot_dimension_numbers<[1], [0], [0], [1], [0, 0, 1, 1], [], []>} : vector<8x32xbf16>, vector<32x64xbf16>, vector<8x64xf32> -> vector<8x64xf32>
    %c0_27 = arith.constant 0 : index
    %c0_28 = arith.constant 0 : index
    %64 = vector.load %arg8[%c0_27, %c0_28] : memref<1x64xf32, #tpu.memory_space<vmem>>, vector<1x64xf32>
    %65 = vector.broadcast %64 : vector<1x64xf32> to vector<8x64xf32>
    %66 = arith.addf %63, %65 : vector<8x64xf32>
    %cst_29 = arith.constant 0.000000e+00 : f32
    %67 = vector.broadcast %cst_29 : f32 to vector<8x64xf32>
    %68 = arith.maximumf %66, %67 : vector<8x64xf32>
    %69 = arith.truncf %68 : vector<8x64xf32> to vector<8x64xbf16>
    %c0_30 = arith.constant 0 : index
    %c0_31 = arith.constant 0 : index
    %70 = vector.load %arg9[%c0_30, %c0_31] : memref<64x32xbf16, #tpu.memory_space<vmem>>, vector<64x32xbf16>
    %cst_32 = arith.constant dense<0.000000e+00> : vector<8x32xf32>
    %71 = tpu.matmul %69, %70, %cst_32 {dimension_numbers = #tpu.dot_dimension_numbers<[1], [0], [0], [1], [0, 0, 1, 1], [], []>} : vector<8x64xbf16>, vector<64x32xbf16>, vector<8x32xf32> -> vector<8x32xf32>
    %72 = vector.broadcast %33 : vector<1x32xf32> to vector<8x32xf32>
    %73 = arith.addf %71, %72 : vector<8x32xf32>
    %74 = arith.addf %60, %73 : vector<8x32xf32>
    %cst_33 = arith.constant dense<0.000000e+00> : vector<8xf32>
    %75 = vector.multi_reduction <add>, %74, %cst_33 [1] : vector<8x32xf32> to vector<8xf32>
    %76 = vector.shape_cast %75 : vector<8xf32> to vector<8x1xf32>
    %cst_34 = arith.constant 3.200000e+01 : f32
    %77 = vector.broadcast %cst_34 : f32 to vector<8x1xf32>
    %78 = arith.divf %76, %77 : vector<8x1xf32>
    %79 = arith.mulf %74, %74 : vector<8x32xf32>
    %cst_35 = arith.constant dense<0.000000e+00> : vector<8xf32>
    %80 = vector.multi_reduction <add>, %79, %cst_35 [1] : vector<8x32xf32> to vector<8xf32>
    %81 = vector.shape_cast %80 : vector<8xf32> to vector<8x1xf32>
    %cst_36 = arith.constant 3.200000e+01 : f32
    %82 = vector.broadcast %cst_36 : f32 to vector<8x1xf32>
    %83 = arith.divf %81, %82 : vector<8x1xf32>
    %84 = arith.mulf %78, %78 : vector<8x1xf32>
    %85 = arith.subf %83, %84 : vector<8x1xf32>
    %86 = vector.broadcast %78 : vector<8x1xf32> to vector<8x32xf32>
    %87 = arith.subf %74, %86 : vector<8x32xf32>
    %cst_37 = arith.constant 9.99999974E-6 : f32
    %88 = vector.broadcast %cst_37 : f32 to vector<8x1xf32>
    %89 = arith.addf %85, %88 : vector<8x1xf32>
    %90 = math.rsqrt %89 : vector<8x1xf32>
    %91 = vector.broadcast %90 : vector<8x1xf32> to vector<8x32xf32>
    %92 = arith.mulf %87, %91 : vector<8x32xf32>
    %93 = vector.broadcast %36 : vector<1x32xf32> to vector<8x32xf32>
    %94 = arith.mulf %92, %93 : vector<8x32xf32>
    %95 = vector.broadcast %37 : vector<1x32xf32> to vector<8x32xf32>
    %96 = arith.addf %94, %95 : vector<8x32xf32>
    %97 = vector.shape_cast %96 : vector<8x32xf32> to vector<1x8x32xf32>
    %c0_38 = arith.constant 0 : index
    %c0_39 = arith.constant 0 : index
    %c0_40 = arith.constant 0 : index
    %98 = vector.load %arg11[%c0_38, %c0_39, %c0_40] : memref<1x8x32xf32, #tpu.memory_space<vmem>>, vector<1x8x32xf32>
    tpu.vector_store %arg11[%c0_38, %c0_39, %c0_40], %97 {strides = array<i32>} : memref<1x8x32xf32, #tpu.memory_space<vmem>>, vector<1x8x32xf32>,
    %99 = arith.truncf %24 : vector<1x8x8xf32> to vector<1x8x8xbf16>
    %c0_41 = arith.constant 0 : index
    %c0_42 = arith.constant 0 : index
    %c0_43 = arith.constant 0 : index
    %100 = vector.load %arg12[%c0_41, %c0_42, %c0_43] : memref<1x8x8xbf16, #tpu.memory_space<vmem>>, vector<1x8x8xbf16>
    tpu.vector_store %arg12[%c0_41, %c0_42, %c0_43], %99 {strides = array<i32>} : memref<1x8x8xbf16, #tpu.memory_space<vmem>>, vector<1x8x8xbf16>,
    return
  }
  func.func @transform_0(%arg0: i32, %arg1: i32) -> (i32, i32, i32) {
    %c0_i32 = arith.constant 0 : i32
    %c0_i32_0 = arith.constant 0 : i32
    %c0_i32_1 = arith.constant 0 : i32
    return %arg0, %c0_i32, %c0_i32_0 : i32, i32, i32
  }
  func.func @transform_1(%arg0: i32, %arg1: i32) -> (i32, i32) {
    %c0_i32 = arith.constant 0 : i32
    %c0_i32_0 = arith.constant 0 : i32
    %c0_i32_1 = arith.constant 0 : i32
    return %c0_i32, %c0_i32_0 : i32, i32
  }
  func.func @transform_2(%arg0: i32, %arg1: i32) -> (i32, i32) {
    %c0_i32 = arith.constant 0 : i32
    %c0_i32_0 = arith.constant 0 : i32
    %c0_i32_1 = arith.constant 0 : i32
    return %c0_i32, %c0_i32_0 : i32, i32
  }
  func.func @transform_3(%arg0: i32, %arg1: i32) -> (i32, i32) {
    %c0_i32 = arith.constant 0 : i32
    %c0_i32_0 = arith.constant 0 : i32
    %c0_i32_1 = arith.constant 0 : i32
    return %c0_i32, %c0_i32_0 : i32, i32
  }
  func.func @transform_4(%arg0: i32, %arg1: i32) -> (i32, i32) {
    %c0_i32 = arith.constant 0 : i32
    %c0_i32_0 = arith.constant 0 : i32
    %c0_i32_1 = arith.constant 0 : i32
    return %c0_i32, %c0_i32_0 : i32, i32
  }
  func.func @transform_5(%arg0: i32, %arg1: i32) -> (i32, i32) {
    %c0_i32 = arith.constant 0 : i32
    %c0_i32_0 = arith.constant 0 : i32
    %c0_i32_1 = arith.constant 0 : i32
    return %c0_i32, %c0_i32_0 : i32, i32
  }
  func.func @transform_6(%arg0: i32, %arg1: i32) -> (i32, i32) {
    %c0_i32 = arith.constant 0 : i32
    %c0_i32_0 = arith.constant 0 : i32
    %c0_i32_1 = arith.constant 0 : i32
    return %c0_i32, %c0_i32_0 : i32, i32
  }
  func.func @transform_7(%arg0: i32, %arg1: i32) -> (i32, i32) {
    %c0_i32 = arith.constant 0 : i32
    %c0_i32_0 = arith.constant 0 : i32
    %c0_i32_1 = arith.constant 0 : i32
    return %c0_i32, %c0_i32_0 : i32, i32
  }
  func.func @transform_8(%arg0: i32, %arg1: i32) -> (i32, i32) {
    %c0_i32 = arith.constant 0 : i32
    %c0_i32_0 = arith.constant 0 : i32
    %c0_i32_1 = arith.constant 0 : i32
    return %c0_i32, %c0_i32_0 : i32, i32
  }
  func.func @transform_9(%arg0: i32, %arg1: i32) -> (i32, i32, i32) {
    %c0_i32 = arith.constant 0 : i32
    %c0_i32_0 = arith.constant 0 : i32
    return %arg0, %arg1, %c0_i32 : i32, i32, i32
  }
  func.func @transform_10(%arg0: i32, %arg1: i32) -> (i32, i32, i32) {
    %c0_i32 = arith.constant 0 : i32
    %c0_i32_0 = arith.constant 0 : i32
    return %arg0, %arg1, %c0_i32 : i32, i32, i32
  }
}

module attributes {stable_mosaic.version = 11 : i64} {
  func.func @kernel(%arg0: i32, %arg1: i32, %arg2: memref<1x16x32xf32, #tpu.memory_space<vmem>>, %arg3: memref<32x32xbf16, #tpu.memory_space<vmem>>, %arg4: memref<32x32xbf16, #tpu.memory_space<vmem>>, %arg5: memref<32x32xbf16, #tpu.memory_space<vmem>>, %arg6: memref<32x32xbf16, #tpu.memory_space<vmem>>, %arg7: memref<32x64xbf16, #tpu.memory_space<vmem>>, %arg8: memref<1x64xf32, #tpu.memory_space<vmem>>, %arg9: memref<64x32xbf16, #tpu.memory_space<vmem>>, %arg10: memref<5x32xf32, #tpu.memory_space<vmem>>, %arg11: memref<1x8x32xf32, #tpu.memory_space<vmem>>, %arg12: memref<1x8x16xbf16, #tpu.memory_space<vmem>>, %arg13: memref<1x16x32xbf16, #tpu.memory_space<vmem>>, %arg14: memref<1x16x32xbf16, #tpu.memory_space<vmem>>) attributes {dimension_semantics = [#tpu.dimension_semantics<parallel>, #tpu.dimension_semantics<arbitrary>], iteration_bounds = array<i64: 2, 2>, scalar_prefetch = 0 : i64, scratch_operands = 2 : i64, tpu.core_type = #tpu.core_type<tc>, window_params = [{transform_indices = @transform_0, window_bounds = array<i64: 1, 16, 32>}, {pipeline_mode = #tpu.pipeline_mode<synchronous>, transform_indices = @transform_1, window_bounds = array<i64: 32, 32>}, {pipeline_mode = #tpu.pipeline_mode<synchronous>, transform_indices = @transform_2, window_bounds = array<i64: 32, 32>}, {pipeline_mode = #tpu.pipeline_mode<synchronous>, transform_indices = @transform_3, window_bounds = array<i64: 32, 32>}, {pipeline_mode = #tpu.pipeline_mode<synchronous>, transform_indices = @transform_4, window_bounds = array<i64: 32, 32>}, {pipeline_mode = #tpu.pipeline_mode<synchronous>, transform_indices = @transform_5, window_bounds = array<i64: 32, 64>}, {pipeline_mode = #tpu.pipeline_mode<synchronous>, transform_indices = @transform_6, window_bounds = array<i64: 1, 64>}, {pipeline_mode = #tpu.pipeline_mode<synchronous>, transform_indices = @transform_7, window_bounds = array<i64: 64, 32>}, {pipeline_mode = #tpu.pipeline_mode<synchronous>, transform_indices = @transform_8, window_bounds = array<i64: 5, 32>}, {transform_indices = @transform_9, window_bounds = array<i64: 1, 8, 32>}, {transform_indices = @transform_10, window_bounds = array<i64: 1, 8, 16>}]} {
    %c0_i32 = arith.constant 0 : i32
    %0 = arith.cmpi eq, %arg1, %c0_i32 : i32
    %1 = arith.extui %0 : i1 to i32
    %c0_i32_0 = arith.constant 0 : i32
    %2 = arith.cmpi ne, %1, %c0_i32_0 : i32
    scf.if %2 {
      %c0_44 = arith.constant 0 : index
      %c0_45 = arith.constant 0 : index
      %c0_46 = arith.constant 0 : index
      %101 = vector.load %arg2[%c0_44, %c0_45, %c0_46] : memref<1x16x32xf32, #tpu.memory_space<vmem>>, vector<1x16x32xf32>
      %102 = vector.shape_cast %101 : vector<1x16x32xf32> to vector<16x32xf32>
      %103 = arith.truncf %102 : vector<16x32xf32> to vector<16x32xbf16>
      %c0_47 = arith.constant 0 : index
      %c0_48 = arith.constant 0 : index
      %104 = vector.load %arg4[%c0_47, %c0_48] : memref<32x32xbf16, #tpu.memory_space<vmem>>, vector<32x32xbf16>
      %cst_49 = arith.constant dense<0.000000e+00> : vector<16x32xf32>
      %105 = tpu.matmul %103, %104, %cst_49 {dimension_numbers = #tpu.dot_dimension_numbers<[1], [0], [0], [1], [0, 0, 1, 1], [], []>} : vector<16x32xbf16>, vector<32x32xbf16>, vector<16x32xf32> -> vector<16x32xf32>
      %c0_50 = arith.constant 0 : index
      %c0_51 = arith.constant 0 : index
      %106 = vector.load %arg5[%c0_50, %c0_51] : memref<32x32xbf16, #tpu.memory_space<vmem>>, vector<32x32xbf16>
      %cst_52 = arith.constant dense<0.000000e+00> : vector<16x32xf32>
      %107 = tpu.matmul %103, %106, %cst_52 {dimension_numbers = #tpu.dot_dimension_numbers<[1], [0], [0], [1], [0, 0, 1, 1], [], []>} : vector<16x32xbf16>, vector<32x32xbf16>, vector<16x32xf32> -> vector<16x32xf32>
      %108 = arith.truncf %105 : vector<16x32xf32> to vector<16x32xbf16>
      %109 = vector.shape_cast %108 : vector<16x32xbf16> to vector<1x16x32xbf16>
      %c0_53 = arith.constant 0 : index
      %c0_54 = arith.constant 0 : index
      %c0_55 = arith.constant 0 : index
      %110 = vector.load %arg13[%c0_53, %c0_54, %c0_55] : memref<1x16x32xbf16, #tpu.memory_space<vmem>>, vector<1x16x32xbf16>
      tpu.vector_store %arg13[%c0_53, %c0_54, %c0_55], %109 {strides = array<i32>} : memref<1x16x32xbf16, #tpu.memory_space<vmem>>, vector<1x16x32xbf16>,
      %111 = arith.truncf %107 : vector<16x32xf32> to vector<16x32xbf16>
      %112 = vector.shape_cast %111 : vector<16x32xbf16> to vector<1x16x32xbf16>
      %c0_56 = arith.constant 0 : index
      %c0_57 = arith.constant 0 : index
      %c0_58 = arith.constant 0 : index
      %113 = vector.load %arg14[%c0_56, %c0_57, %c0_58] : memref<1x16x32xbf16, #tpu.memory_space<vmem>>, vector<1x16x32xbf16>
      tpu.vector_store %arg14[%c0_56, %c0_57, %c0_58], %112 {strides = array<i32>} : memref<1x16x32xbf16, #tpu.memory_space<vmem>>, vector<1x16x32xbf16>,
    } else {
    }
    %c8_i32 = arith.constant 8 : i32
    %3 = arith.muli %arg1, %c8_i32 : i32
    %4 = tpu.assume_multiple %3, 8 : i32
    %c0 = arith.constant 0 : index
    %5 = arith.index_cast %4 : i32 to index
    %c0_1 = arith.constant 0 : index
    %6 = vector.load %arg2[%c0, %5, %c0_1] : memref<1x16x32xf32, #tpu.memory_space<vmem>>, vector<1x8x32xf32>
    %7 = vector.shape_cast %6 : vector<1x8x32xf32> to vector<8x32xf32>
    %8 = arith.truncf %7 : vector<8x32xf32> to vector<8x32xbf16>
    %c0_2 = arith.constant 0 : index
    %c0_3 = arith.constant 0 : index
    %9 = vector.load %arg3[%c0_2, %c0_3] : memref<32x32xbf16, #tpu.memory_space<vmem>>, vector<32x32xbf16>
    %cst = arith.constant dense<0.000000e+00> : vector<8x32xf32>
    %10 = tpu.matmul %8, %9, %cst {dimension_numbers = #tpu.dot_dimension_numbers<[1], [0], [0], [1], [0, 0, 1, 1], [], []>} : vector<8x32xbf16>, vector<32x32xbf16>, vector<8x32xf32> -> vector<8x32xf32>
    %11 = arith.truncf %10 : vector<8x32xf32> to vector<8x32xbf16>
    %12 = vector.shape_cast %11 : vector<8x32xbf16> to vector<1x8x32xbf16>
    %c0_4 = arith.constant 0 : index
    %c0_5 = arith.constant 0 : index
    %c0_6 = arith.constant 0 : index
    %13 = vector.load %arg13[%c0_4, %c0_5, %c0_6] : memref<1x16x32xbf16, #tpu.memory_space<vmem>>, vector<1x16x32xbf16>
    "tpu.trace_start"() <{level = 10 : i32, message = "bqd,bkd->bqk"}> : () -> ()
    %cst_7 = arith.constant dense<0.000000e+00> : vector<1x8x16xf32>
    %14 = tpu.matmul %12, %13, %cst_7 {dimension_numbers = #tpu.dot_dimension_numbers<[2], [2], [1], [1], [0, 0, 0, 1, 1, 1], [0], [0]>} : vector<1x8x32xbf16>, vector<1x16x32xbf16>, vector<1x8x16xf32> -> vector<1x8x16xf32>
    "tpu.trace_stop"() : () -> ()
    %cst_8 = arith.constant dense<0xFF800000> : vector<1x8xf32>
    %15 = vector.multi_reduction <maximumf>, %14, %cst_8 [2] : vector<1x8x16xf32> to vector<1x8xf32>
    %16 = vector.shape_cast %15 : vector<1x8xf32> to vector<1x8x1xf32>
    %17 = vector.broadcast %16 : vector<1x8x1xf32> to vector<1x8x16xf32>
    %18 = arith.subf %14, %17 : vector<1x8x16xf32>
    %19 = math.exp %18 : vector<1x8x16xf32>
    %cst_9 = arith.constant dense<0.000000e+00> : vector<1x8xf32>
    %20 = vector.multi_reduction <add>, %19, %cst_9 [2] : vector<1x8x16xf32> to vector<1x8xf32>
    %21 = vector.shape_cast %20 : vector<1x8xf32> to vector<1x8x1xf32>
    %22 = tpu.reciprocal %21 {approx = true} : vector<1x8x1xf32> -> vector<1x8x1xf32>
    %23 = vector.broadcast %22 : vector<1x8x1xf32> to vector<1x8x16xf32>
    %24 = arith.mulf %19, %23 : vector<1x8x16xf32>
    %25 = arith.truncf %24 : vector<1x8x16xf32> to vector<1x8x16xbf16>
    %c0_10 = arith.constant 0 : index
    %c0_11 = arith.constant 0 : index
    %c0_12 = arith.constant 0 : index
    %26 = vector.load %arg14[%c0_10, %c0_11, %c0_12] : memref<1x16x32xbf16, #tpu.memory_space<vmem>>, vector<1x16x32xbf16>
    "tpu.trace_start"() <{level = 10 : i32, message = "bqk,bkd->bqd"}> : () -> ()
    %cst_13 = arith.constant dense<0.000000e+00> : vector<1x8x32xf32>
    %27 = tpu.matmul %25, %26, %cst_13 {dimension_numbers = #tpu.dot_dimension_numbers<[2], [1], [1], [2], [0, 0, 0, 1, 1, 2], [0], [0]>} : vector<1x8x16xbf16>, vector<1x16x32xbf16>, vector<1x8x32xf32> -> vector<1x8x32xf32>
    "tpu.trace_stop"() : () -> ()
    %28 = vector.shape_cast %27 : vector<1x8x32xf32> to vector<8x32xf32>
    %29 = arith.truncf %28 : vector<8x32xf32> to vector<8x32xbf16>
    %c0_14 = arith.constant 0 : index
    %c0_15 = arith.constant 0 : index
    %30 = vector.load %arg6[%c0_14, %c0_15] : memref<32x32xbf16, #tpu.memory_space<vmem>>, vector<32x32xbf16>
    %cst_16 = arith.constant dense<0.000000e+00> : vector<8x32xf32>
    %31 = tpu.matmul %29, %30, %cst_16 {dimension_numbers = #tpu.dot_dimension_numbers<[1], [0], [0], [1], [0, 0, 1, 1], [], []>} : vector<8x32xbf16>, vector<32x32xbf16>, vector<8x32xf32> -> vector<8x32xf32>
    %c0_17 = arith.constant 0 : index
    %c0_18 = arith.constant 0 : index
    %32 = vector.load %arg10[%c0_17, %c0_18] : memref<5x32xf32, #tpu.memory_space<vmem>>, vector<5x32xf32>
    %33 = vector.extract_strided_slice %32 {offsets = [0, 0], sizes = [1, 32], strides = [1, 1]} : vector<5x32xf32> to vector<1x32xf32>
    %34 = vector.extract_strided_slice %32 {offsets = [1, 0], sizes = [1, 32], strides = [1, 1]} : vector<5x32xf32> to vector<1x32xf32>
    %35 = vector.extract_strided_slice %32 {offsets = [2, 0], sizes = [1, 32], strides = [1, 1]} : vector<5x32xf32> to vector<1x32xf32>
    %36 = vector.extract_strided_slice %32 {offsets = [3, 0], sizes = [1, 32], strides = [1, 1]} : vector<5x32xf32> to vector<1x32xf32>
    %37 = vector.extract_strided_slice %32 {offsets = [4, 0], sizes = [1, 32], strides = [1, 1]} : vector<5x32xf32> to vector<1x32xf32>
    %38 = arith.addf %7, %31 : vector<8x32xf32>
    %cst_19 = arith.constant dense<0.000000e+00> : vector<8xf32>
    %39 = vector.multi_reduction <add>, %38, %cst_19 [1] : vector<8x32xf32> to vector<8xf32>
    %40 = vector.shape_cast %39 : vector<8xf32> to vector<8x1xf32>
    %cst_20 = arith.constant 3.200000e+01 : f32
    %41 = vector.broadcast %cst_20 : f32 to vector<8x1xf32>
    %42 = arith.divf %40, %41 : vector<8x1xf32>
    %43 = arith.mulf %38, %38 : vector<8x32xf32>
    %cst_21 = arith.constant dense<0.000000e+00> : vector<8xf32>
    %44 = vector.multi_reduction <add>, %43, %cst_21 [1] : vector<8x32xf32> to vector<8xf32>
    %45 = vector.shape_cast %44 : vector<8xf32> to vector<8x1xf32>
    %cst_22 = arith.constant 3.200000e+01 : f32
    %46 = vector.broadcast %cst_22 : f32 to vector<8x1xf32>
    %47 = arith.divf %45, %46 : vector<8x1xf32>
    %48 = arith.mulf %42, %42 : vector<8x1xf32>
    %49 = arith.subf %47, %48 : vector<8x1xf32>
    %50 = vector.broadcast %42 : vector<8x1xf32> to vector<8x32xf32>
    %51 = arith.subf %38, %50 : vector<8x32xf32>
    %cst_23 = arith.constant 9.99999974E-6 : f32
    %52 = vector.broadcast %cst_23 : f32 to vector<8x1xf32>
    %53 = arith.addf %49, %52 : vector<8x1xf32>
    %54 = math.rsqrt %53 : vector<8x1xf32>
    %55 = vector.broadcast %54 : vector<8x1xf32> to vector<8x32xf32>
    %56 = arith.mulf %51, %55 : vector<8x32xf32>
    %57 = vector.broadcast %34 : vector<1x32xf32> to vector<8x32xf32>
    %58 = arith.mulf %56, %57 : vector<8x32xf32>
    %59 = vector.broadcast %35 : vector<1x32xf32> to vector<8x32xf32>
    %60 = arith.addf %58, %59 : vector<8x32xf32>
    %61 = arith.truncf %60 : vector<8x32xf32> to vector<8x32xbf16>
    %c0_24 = arith.constant 0 : index
    %c0_25 = arith.constant 0 : index
    %62 = vector.load %arg7[%c0_24, %c0_25] : memref<32x64xbf16, #tpu.memory_space<vmem>>, vector<32x64xbf16>
    %cst_26 = arith.constant dense<0.000000e+00> : vector<8x64xf32>
    %63 = tpu.matmul %61, %62, %cst_26 {dimension_numbers = #tpu.dot_dimension_numbers<[1], [0], [0], [1], [0, 0, 1, 1], [], []>} : vector<8x32xbf16>, vector<32x64xbf16>, vector<8x64xf32> -> vector<8x64xf32>
    %c0_27 = arith.constant 0 : index
    %c0_28 = arith.constant 0 : index
    %64 = vector.load %arg8[%c0_27, %c0_28] : memref<1x64xf32, #tpu.memory_space<vmem>>, vector<1x64xf32>
    %65 = vector.broadcast %64 : vector<1x64xf32> to vector<8x64xf32>
    %66 = arith.addf %63, %65 : vector<8x64xf32>
    %cst_29 = arith.constant 0.000000e+00 : f32
    %67 = vector.broadcast %cst_29 : f32 to vector<8x64xf32>
    %68 = arith.maximumf %66, %67 : vector<8x64xf32>
    %69 = arith.truncf %68 : vector<8x64xf32> to vector<8x64xbf16>
    %c0_30 = arith.constant 0 : index
    %c0_31 = arith.constant 0 : index
    %70 = vector.load %arg9[%c0_30, %c0_31] : memref<64x32xbf16, #tpu.memory_space<vmem>>, vector<64x32xbf16>
    %cst_32 = arith.constant dense<0.000000e+00> : vector<8x32xf32>
    %71 = tpu.matmul %69, %70, %cst_32 {dimension_numbers = #tpu.dot_dimension_numbers<[1], [0], [0], [1], [0, 0, 1, 1], [], []>} : vector<8x64xbf16>, vector<64x32xbf16>, vector<8x32xf32> -> vector<8x32xf32>
    %72 = vector.broadcast %33 : vector<1x32xf32> to vector<8x32xf32>
    %73 = arith.addf %71, %72 : vector<8x32xf32>
    %74 = arith.addf %60, %73 : vector<8x32xf32>
    %cst_33 = arith.constant dense<0.000000e+00> : vector<8xf32>
    %75 = vector.multi_reduction <add>, %74, %cst_33 [1] : vector<8x32xf32> to vector<8xf32>
    %76 = vector.shape_cast %75 : vector<8xf32> to vector<8x1xf32>
    %cst_34 = arith.constant 3.200000e+01 : f32
    %77 = vector.broadcast %cst_34 : f32 to vector<8x1xf32>
    %78 = arith.divf %76, %77 : vector<8x1xf32>
    %79 = arith.mulf %74, %74 : vector<8x32xf32>
    %cst_35 = arith.constant dense<0.000000e+00> : vector<8xf32>
    %80 = vector.multi_reduction <add>, %79, %cst_35 [1] : vector<8x32xf32> to vector<8xf32>
    %81 = vector.shape_cast %80 : vector<8xf32> to vector<8x1xf32>
    %cst_36 = arith.constant 3.200000e+01 : f32
    %82 = vector.broadcast %cst_36 : f32 to vector<8x1xf32>
    %83 = arith.divf %81, %82 : vector<8x1xf32>
    %84 = arith.mulf %78, %78 : vector<8x1xf32>
    %85 = arith.subf %83, %84 : vector<8x1xf32>
    %86 = vector.broadcast %78 : vector<8x1xf32> to vector<8x32xf32>
    %87 = arith.subf %74, %86 : vector<8x32xf32>
    %cst_37 = arith.constant 9.99999974E-6 : f32
    %88 = vector.broadcast %cst_37 : f32 to vector<8x1xf32>
    %89 = arith.addf %85, %88 : vector<8x1xf32>
    %90 = math.rsqrt %89 : vector<8x1xf32>
    %91 = vector.broadcast %90 : vector<8x1xf32> to vector<8x32xf32>
    %92 = arith.mulf %87, %91 : vector<8x32xf32>
    %93 = vector.broadcast %36 : vector<1x32xf32> to vector<8x32xf32>
    %94 = arith.mulf %92, %93 : vector<8x32xf32>
    %95 = vector.broadcast %37 : vector<1x32xf32> to vector<8x32xf32>
    %96 = arith.addf %94, %95 : vector<8x32xf32>
    %97 = vector.shape_cast %96 : vector<8x32xf32> to vector<1x8x32xf32>
    %c0_38 = arith.constant 0 : index
    %c0_39 = arith.constant 0 : index
    %c0_40 = arith.constant 0 : index
    %98 = vector.load %arg11[%c0_38, %c0_39, %c0_40] : memref<1x8x32xf32, #tpu.memory_space<vmem>>, vector<1x8x32xf32>
    tpu.vector_store %arg11[%c0_38, %c0_39, %c0_40], %97 {strides = array<i32>} : memref<1x8x32xf32, #tpu.memory_space<vmem>>, vector<1x8x32xf32>,
    %99 = arith.truncf %24 : vector<1x8x16xf32> to vector<1x8x16xbf16>
    %c0_41 = arith.constant 0 : index
    %c0_42 = arith.constant 0 : index
    %c0_43 = arith.constant 0 : index
    %100 = vector.load %arg12[%c0_41, %c0_42, %c0_43] : memref<1x8x16xbf16, #tpu.memory_space<vmem>>, vector<1x8x16xbf16>
    tpu.vector_store %arg12[%c0_41, %c0_42, %c0_43], %99 {strides = array<i32>} : memref<1x8x16xbf16, #tpu.memory_space<vmem>>, vector<1x8x16xbf16>,
    return
  }
  func.func @transform_0(%arg0: i32, %arg1: i32) -> (i32, i32, i32) {
    %c0_i32 = arith.constant 0 : i32
    %c0_i32_0 = arith.constant 0 : i32
    %c0_i32_1 = arith.constant 0 : i32
    return %arg0, %c0_i32, %c0_i32_0 : i32, i32, i32
  }
  func.func @transform_1(%arg0: i32, %arg1: i32) -> (i32, i32) {
    %c0_i32 = arith.constant 0 : i32
    %c0_i32_0 = arith.constant 0 : i32
    %c0_i32_1 = arith.constant 0 : i32
    return %c0_i32, %c0_i32_0 : i32, i32
  }
  func.func @transform_2(%arg0: i32, %arg1: i32) -> (i32, i32) {
    %c0_i32 = arith.constant 0 : i32
    %c0_i32_0 = arith.constant 0 : i32
    %c0_i32_1 = arith.constant 0 : i32
    return %c0_i32, %c0_i32_0 : i32, i32
  }
  func.func @transform_3(%arg0: i32, %arg1: i32) -> (i32, i32) {
    %c0_i32 = arith.constant 0 : i32
    %c0_i32_0 = arith.constant 0 : i32
    %c0_i32_1 = arith.constant 0 : i32
    return %c0_i32, %c0_i32_0 : i32, i32
  }
  func.func @transform_4(%arg0: i32, %arg1: i32) -> (i32, i32) {
    %c0_i32 = arith.constant 0 : i32
    %c0_i32_0 = arith.constant 0 : i32
    %c0_i32_1 = arith.constant 0 : i32
    return %c0_i32, %c0_i32_0 : i32, i32
  }
  func.func @transform_5(%arg0: i32, %arg1: i32) -> (i32, i32) {
    %c0_i32 = arith.constant 0 : i32
    %c0_i32_0 = arith.constant 0 : i32
    %c0_i32_1 = arith.constant 0 : i32
    return %c0_i32, %c0_i32_0 : i32, i32
  }
  func.func @transform_6(%arg0: i32, %arg1: i32) -> (i32, i32) {
    %c0_i32 = arith.constant 0 : i32
    %c0_i32_0 = arith.constant 0 : i32
    %c0_i32_1 = arith.constant 0 : i32
    return %c0_i32, %c0_i32_0 : i32, i32
  }
  func.func @transform_7(%arg0: i32, %arg1: i32) -> (i32, i32) {
    %c0_i32 = arith.constant 0 : i32
    %c0_i32_0 = arith.constant 0 : i32
    %c0_i32_1 = arith.constant 0 : i32
    return %c0_i32, %c0_i32_0 : i32, i32
  }
  func.func @transform_8(%arg0: i32, %arg1: i32) -> (i32, i32) {
    %c0_i32 = arith.constant 0 : i32
    %c0_i32_0 = arith.constant 0 : i32
    %c0_i32_1 = arith.constant 0 : i32
    return %c0_i32, %c0_i32_0 : i32, i32
  }
  func.func @transform_9(%arg0: i32, %arg1: i32) -> (i32, i32, i32) {
    %c0_i32 = arith.constant 0 : i32
    %c0_i32_0 = arith.constant 0 : i32
    return %arg0, %arg1, %c0_i32 : i32, i32, i32
  }
  func.func @transform_10(%arg0: i32, %arg1: i32) -> (i32, i32, i32) {
    %c0_i32 = arith.constant 0 : i32
    %c0_i32_0 = arith.constant 0 : i32
    return %arg0, %arg1, %c0_i32 : i32, i32, i32
  }
}

</mosaic_0001>

<bundles_post_ra>
// kernel: fwd.2
= control target key start
LH: loop header
LB: loop body
LE: loop exit
PB: predicated region body
PF: predicated region fallthrough
CT: control target
= control target key end

     0   :  { %s2018_s0 = inlined_call_operand.vmem [shape: f32[2,16,32], index: 0, kind: input, shape index: {}]   ;;  %s2019_s1 = inlined_call_operand.vmem [shape: bf16[32,32], index: 1, kind: input, shape index: {}]   ;;  %s2020_s2 = inlined_call_operand.vmem [shape: bf16[32,32], index: 2, kind: input, shape index: {}]   ;;  %s2021_s3 = inlined_call_operand.vmem [shape: bf16[32,32], index: 3, kind: input, shape index: {}]   ;;  %s2022_s4 = inlined_call_operand.hbm [shape: bf16[32,32], index: 4, kind: input, shape index: {}]   ;;  %s2023_s5 = inlined_call_operand.hbm [shape: bf16[32,64], index: 5, kind: input, shape index: {}]   ;;  %s2024_s6 = inlined_call_operand.vmem [shape: f32[1,64], index: 6, kind: input, shape index: {}]   ;;  %s2025_s7 = inlined_call_operand.vmem [shape: bf16[64,32], index: 7, kind: input, shape index: {}]   ;;  %s2026_s8 = inlined_call_operand.hbm [shape: f32[5,32], index: 8, kind: input, shape index: {}]   ;;  %s2027_s9 = inlined_call_operand.vmem [shape: f32[2,16,32], index: 9, kind: output, shape index: {0}]   ;;  %s2028_s10 = inlined_call_operand.hbm [shape: bf16[2,16,16], index: 10, kind: output, shape index: {1}]  }
   0x1   :  { %2045 = sst [smem:[#allocation24_spill]] %s2028_s10 }
   0x2   :  { %16 = vsyncpa [#allocation5], 0 }
   0x3   :  { %17 = vsyncpa [#allocation8], 0 }
   0x4   :  { %18 = vsyncpa [#allocation6], 0 }
   0x5   :  { %20 = vsyncpa [#allocation6 + $0x1], 0  ;;  %s1686_s13 = smov 0   ;;  %s1688_s14 = smov 0  }
   0x6   :  { %s1690_s15 = smov 0   ;;  %s1692_s16 = smov 0  }
   0x7   :  { %s1694_s17 = smov 0   ;;  %s1696_s18 = smov 0  }
   0x8   :  { %s1698_s19 = smov 0   ;;  %s1700_s20 = smov 0  }
   0x9 LB: > { %2046 = sst [smem:[#allocation14_spill]] %s1591_s13  ;;  %s1168_s21 = sadd.s32 4294967295, %s1619_s20   ;;  %s1619_s20 = sphi %s1700_s20, %s26_s20   ;;  %s1615_s19 = sphi %s1698_s19, %s2076_s19   ;;  %s1611_s18 = sphi %s1696_s18, %s2075_s18   ;;  %s1607_s17 = sphi %s1694_s17, %s2074_s17   ;;  %s1603_s16 = sphi %s1692_s16, %s2073_s16   ;;  %s1599_s15 = sphi %s1690_s15, %s2072_s15   ;;  %s1595_s14 = sphi %s1688_s14, %s2078_s14   ;;  %s1591_s13 = sphi %s1686_s13, %s2077_s13  }
   0xa   : > { %2047 = sst [smem:[#allocation15_spill]] %s1599_s15  ;;  %s1169_s22 = sadd.s32 4294967294, %s1619_s20  }
   0xb   : > { %2048 = sst [smem:[#allocation16_spill]] %s1611_s18  ;;  %s35_s23 = sadd.s32 1, %s1611_s18 }
   0xc   : > { %2049 = sst [smem:[#allocation17_spill]] %s1615_s19  ;;  %s38_s24 = sadd.s32 1, %s1615_s19 }
   0xd   : > { %2050 = sst [smem:[#allocation18_spill]] %s1619_s20  ;;  %p36_p0 = scmp.ge.s32.totalorder %s35_s23, 2 }
   0xe   : > { %s269_s25 = sadd.s32 1, %s1599_s15  ;;  %p279_p1 = scmp.ne.s32.totalorder %s1599_s15, %s1595_s14 }
   0xf   : > { %p280_p2 = scmp.eq.s32.totalorder %s1168_s21, 3  ;;  %s2080_s23 = smov (%p36_p0, %s35_s23), 0 }
  0x10   : > { %2051 = sst [smem:[#allocation19_spill]] %s2080_s23  ;;  %s2082_s24 = smov (!%p36_p0, %s38_s24), %s1615_s19 }
  0x11   : > { %s265_s26 = ssub.s32 %s1611_s18, %s2080_s23  ;;  %p1738_p3 = por %p280_p2, %p279_p1 }
  0x12   : > { %p40_p4 = scmp.ge.s32.totalorder %s2082_s24, 2  ;;  %p285_p5 = scmp.ne.s32.totalorder %s1595_s14, %s1591_s13 }
  0x13   : > { %s2052_s27 = scalar_select %p1738_p3, 1, 0 }
  0x14   : > { %p286_p6 = scmp.eq.s32.totalorder %s1169_s22, 3  ;;  %p1170_p7 = scmp.ge.s32.totalorder %s1619_s20, 1 }
  0x15   : > { %2053 = sst [smem:[#allocation20_spill]] %s2052_s27  ;;  %s2084_s24 = smov (%p40_p4, %s2082_s24), 0 }
  0x16   : > { %2054 = sst [smem:[#allocation21_spill]] %s2084_s24  ;;  %p1747_p8 = por %p286_p6, %p285_p5 }
  0x17   : > { %p293_p9 = scmp.lt.s32.totalorder %s1619_s20, 5  ;;  %s264_s29 = ssub.s32 %s1615_s19, %s2084_s24 }
  0x18   : > { %s2055_s28 = scalar_select %p1747_p8, 1, 0 }
  0x19   : > { %s266_s30 = sor.u32 %s265_s26, %s264_s29  ;;  %p1754_p10 = pnand %p1170_p7, %p293_p9 }
  0x1a   : > { %2056 = sst [smem:[#allocation22_spill]] %s2055_s28  ;;  %p267_p11 = scmp.eq.s32.totalorder %s266_s30, 0 }
  0x1b   : > { %s2057_s11 = scalar_select %p1754_p10, 1, 0 }
  0x1c   : > { %p1758_p12 = scmp.eq.s32.totalorder %s1168_s21, 0  ;;  %p1317_p13 = pneg %p1754_p10 }
  0x1d   : > { %s1765_s22 = scalar_select %p267_p11, %s1599_s15, %s269_s25  }
  0x1e   : > { %s2058_s12 = scalar_select %p1758_p12, 1, 0 }
  0x1f   : > { %2059 = sst [smem:[#allocation23_spill]] %s1765_s22  ;;  %p1769_p0 = pnand %p1758_p12, %p1317_p13 }
  0x20   : > { %s1621_s26 = smov [#allocation7]   ;;  %s1433_s21 = scalar_lea.hbm %s2023_s5, 256 }
  0x21   : > { %s327_s29 = sshll.u32 %s1621_s26, 4  ;;  %p1434_p1 = scmp.ne.s32.totalorder %s2023_s5, %s1433_s21  ;;  %s328_s29 = int_to_ptr.vmem [resolvable:$true] %s327_s29 }
  0x22   : > { %p1781_p2 = pneg %p1769_p0  ;;  %p1440_p6 = scmp.lt.u32.totalorder %s1433_s21, %s2023_s5 }
  0x24   : > { %p1436_p4 = pnand %p1781_p2, %p1434_p1 }
  0x26   : > { %p1437_p5 = pneg %p1436_p4 }
  0x28   : > { %p1442_p7 = pnand %p1440_p6, %p1437_p5 }
  0x2a   : > { %1445 = shalt.err (!%p1442_p7)
}
  0x2b   : > { %s1446_s24 = scalar_lea.vmem %s328_s29, 256  ;;  %p1454_p8 = scmp.lt.s32.totalorder %s328_s29, %s328_s29 }
  0x2c   : > { %p1447_p9 = scmp.ne.s32.totalorder %s328_s29, %s1446_s24  ;;  %p1455_p3 = scmp.lt.s32.totalorder %s1446_s24, %s1446_s24 }
  0x2e   : > { %p1449_p11 = pnand %p1447_p9, %p1781_p2  ;;  %p1456_p12 = por %p1455_p3, %p1454_p8 }
  0x30   : > { %p1450_p13 = pneg %p1449_p11 }
  0x32   : > { %p1457_p10 = pnand %p1456_p12, %p1450_p13 }
  0x34   : > { %1460 = shalt.err (!%p1457_p10)
}
  0x35   : > { %s1622_s18 = smov 64   ;;  %s1623_s19 = smov 4  }
  0x36   : > { %1323 = dma.hbm_to_vmem [thread:$0]  (!%p1769_p0), %s2023_s5, 256, %s328_s29, [#allocation8], %s1622_s18, %s1622_s18, %s1623_s19  }
  0x37   : > { %s1624_s21 = smov [#allocation4]   ;;  %s1625_s15 = smov [#allocation9]  }
  0x38   : > { %s314_s26 = sshll.u32 %s1624_s21, 4  ;;  %s347_s28 = sshll.u32 %s1625_s15, 4  ;;  %s315_s26 = int_to_ptr.vmem [resolvable:$true] %s314_s26  ;;  %s1797_s28 = int_to_ptr.vmem [resolvable:$true] %s347_s28 }
  0x39   : > { %s1461_s20 = scalar_lea.hbm %s2022_s4, 256 }
  0x3a   : > { %p1462_p3 = scmp.ne.s32.totalorder %s2022_s4, %s1461_s20  ;;  %p1468_p12 = scmp.lt.u32.totalorder %s1461_s20, %s2022_s4 }
  0x3c   : > { %p1464_p8 = pnand %p1462_p3, %p1781_p2 }
  0x3e   : > { %p1465_p10 = pneg %p1464_p8 }
  0x40   : > { %p1470_p1 = pnand %p1468_p12, %p1465_p10 }
  0x42   : > { %1473 = shalt.err (!%p1470_p1)
}
  0x43   : > { %s1474_s15 = scalar_lea.vmem %s315_s26, 256  ;;  %p1482_p7 = scmp.lt.s32.totalorder %s315_s26, %s315_s26 }
  0x44   : > { %p1475_p4 = scmp.ne.s32.totalorder %s315_s26, %s1474_s15  ;;  %p1483_p9 = scmp.lt.s32.totalorder %s1474_s15, %s1474_s15 }
  0x46   : > { %p1477_p5 = pnand %p1475_p4, %p1781_p2  ;;  %p1484_p11 = por %p1483_p9, %p1482_p7 }
  0x48   : > { %p1478_p6 = pneg %p1477_p5 }
  0x4a   : > { %p1485_p13 = pnand %p1484_p11, %p1478_p6 }
  0x4c   : > { %1488 = shalt.err (!%p1485_p13)
}
  0x4d   : > { %1320 = dma.hbm_to_vmem [thread:$0]  (!%p1769_p0), %s2022_s4, 256, %s315_s26, [#allocation5], %s1622_s18, %s1622_s18, %s1623_s19  }
  0x4e   : > { %s1489_s30 = scalar_lea.hbm %s2026_s8, 128 }
  0x4f   : > { %p1490_p3 = scmp.ne.s32.totalorder %s2026_s8, %s1489_s30  ;;  %p1496_p12 = scmp.lt.u32.totalorder %s1489_s30, %s2026_s8 }
  0x51   : > { %p1492_p8 = pnand %p1490_p3, %p1781_p2 }
  0x53   : > { %p1493_p10 = pneg %p1492_p8 }
  0x55   : > { %p1498_p1 = pnand %p1496_p12, %p1493_p10 }
  0x57   : > { %1501 = shalt.err (!%p1498_p1)
}
  0x58   : > { %s1502_s18 = scalar_lea.vmem %s1797_s28, 128  ;;  %p1510_p7 = scmp.lt.s32.totalorder %s1797_s28, %s1797_s28 }
  0x59   : > { %p1503_p4 = scmp.ne.s32.totalorder %s1797_s28, %s1502_s18  ;;  %p1511_p9 = scmp.lt.s32.totalorder %s1502_s18, %s1502_s18 }
  0x5b   : > { %p1505_p5 = pnand %p1503_p4, %p1781_p2  ;;  %p1512_p11 = por %p1511_p9, %p1510_p7 }
  0x5d   : > { %p1506_p6 = pneg %p1505_p5 }
  0x5f   : > { %p1513_p13 = pnand %p1512_p11, %p1506_p6 }
  0x61   : > { %1516 = shalt.err (!%p1513_p13)
}
  0x62   : > { %1326 = dma.hbm_to_vmem [thread:$0]  (!%p1769_p0), %s2026_s8, 128, %s1797_s28, [#allocation8]  }
  0x63   : > { %p2062_p3 = scmp.ne.s32.totalorder %s2057_s11, 0 }
  0x64   : > { %p2063_p8 = scmp.ne.s32.totalorder (!%p2062_p3), %s2058_s12, 0 }
  0x65   : > { %368 = sbr.rel (%p2062_p3) target bundleno = 2300 (0x8fc), region = 56 }
  0x6c   : > { %1578 = dma.done.wait (%p2063_p8), [#allocation5], 256  }
  0x6d   : > { %1580 = vsyncadd (%p2063_p8), [#allocation5], 4294967040 }
  0x6e   : > { %1582 = dma.done.wait (%p2063_p8), [#allocation8], 384  }
  0x6f   : > { %1584 = vsyncadd (%p2063_p8), [#allocation8], 4294966912  ;;  %s419_s23 = sand.u32 1, %s1595_s14   ;;  %p422_p0 = scmp.lt.s32.totalorder %s1607_s17, 1 }
  0x70   : > { %s1854_s28 = sshll.u32 %s419_s23, 2  ;;  %p429_p2 = scmp.lt.s32.totalorder %s1603_s16, 1 }
  0x71   : > { %s423_s11 = scalar_select %p422_p0, %s1607_s17, 1 }
  0x72   : > { %s430_s25 = scalar_select %p429_p2, %s1603_s16, 1 }
  0x73   : > { %s1214_s15 = sshll.u32 %s423_s11, 4  ;;  %s1182_s10 = sshll.u32 %s423_s11, 1 }
  0x74   : > { %s1862_s20 = scalar_lea.vmem %s2018_s0, %s1214_s15  ;;  %s432_s27 = sadd.s32 %s1182_s10, %s430_s25 }
  0x75   : > { %s1183_s30 = sshll.u32 %s432_s27, 3  ;;  %s421_s29 = scalar_lea.vmem [#allocation10], %s1854_s28 }
  0x76   : > { %s1867_s22 = scalar_lea.vmem %s2027_s9, %s1183_s30  ;;  %p1184_p10 = scmp.ne.s32.totalorder %s1603_s16, 0 }
  0x77   : > { %v1411_v0 = vld [vmem:[%s2020_s2] sm:$0xff] (!%p1184_p10)   ;;  %v1626_v1 = vmov (!%p1184_p10), 0.0   ;;  %v1413_v3 = vld [vmem:[%s2020_s2 + $0x8] sm:$0xff] (!%p1184_p10)   ;;  %vm1627_vm0 = vmmov (!%p1184_p10), 0   ;;  %vm459_vm1 = vcmask (!%p1184_p10), 261120  }
  0x78   : > { %439 = sbr.rel (%p1184_p10) target bundleno = 346 (0x15a), region = 72  ;;  %1239 = vmatprep.subr.bf16.mxu0 (!%p1184_p10), %v1626_v1  ;;  %1247 = vmatprep.subr.bf16.mxu1 (!%p1184_p10), %v1626_v1  ;;  %v1412_v2 = vld [vmem:[%s2021_s3] sm:$0xff] (!%p1184_p10)   ;;  %v1414_v4 = vld [vmem:[%s2021_s3 + $0x8] sm:$0xff] (!%p1184_p10)  }
  0x79   : > { %1240 = vmatpush3.bf16.msra.mxu0 (!%p1184_p10), %v1411_v0  ;;  %1243 = vmatprep.mubr.msk.bf16.mxu0 (!%p1184_p10), %vm1627_vm0, %v1626_v1  ;;  %v440_v5 = vld [vmem:[%s1862_s20] sm:$0xff] (!%p1184_p10)  ;;  %v441_v6 = vld [vmem:[%s1862_s20 + $0x8] sm:$0xff] (!%p1184_p10) }
  0x7a   : > { %1248 = vmatpush3.bf16.msra.mxu1 (!%p1184_p10), %v1412_v2  ;;  %1241 = vmatprep.subr.bf16.mxu0 (!%p1184_p10), %v1626_v1  ;;  %v442_v7 = vpack.c.bf16 (!%p1184_p10), %v441_v6, %v440_v5 }
  0x7b   : > { %1249 = vmatprep.subr.bf16.mxu1 (!%p1184_p10), %v1626_v1  ;;  %1251 = vmatprep.mubr.msk.bf16.mxu1 (!%p1184_p10), %vm1627_vm0, %v1626_v1 }
  0x7d   : > { %1242 = vmatpush3.bf16.msra.mxu0 (!%p1184_p10), %v1413_v3 }
  0x7e   : > { %1250 = vmatpush3.bf16.msra.mxu1 (!%p1184_p10), %v1414_v4 }
  0x80   : > { %1244 = vmatmul.mubr.msk.bf16.vlgmr.msra.gmra.mrb[0].mxu0 %vm459_vm1, %v442_v7 }
  0x81   : > { %1252 = vmatmul.mubr.msk.bf16.vlgmr.msra.gmra.mrb[0].mxu1 %vm459_vm1, %v442_v7 }
 0x153   : > { %v497_v8 = vpop.f32.mrb[0].mxu0 }
 0x154   : > { %v554_v9 = vpop.f32.mrb[0].mxu1  ;;  %v1245_v10 = vpop.f32.mrb[1].mxu0 }
 0x155   : > { %v1253_v11 = vpop.f32.mrb[1].mxu1  ;;  %v500_v12 = vpop.f32.mrb[2].mxu0 }
 0x156   : > { %v561_v13 = vpack.c.bf16 %v500_v12, %v497_v8  ;;  %v557_v14 = vpop.f32.mrb[2].mxu1  ;;  %v1246_v15 = vpop.f32.mrb[3].mxu0 }
 0x157   : > { %v563_v16 = vpack.c.bf16 %v557_v14, %v554_v9  ;;  %v1254_v17 = vpop.f32.mrb[3].mxu1 }
 0x158   : > { %562 = vst.msk [vmem:[#allocation2] sm:$0xff] %vm459_vm1, %v561_v13 }
 0x159   : > { %564 = vst.msk [vmem:[#allocation3] sm:$0xff] %vm459_vm1, %v563_v16 }
 0x15a PF: > { %v1415_v18 = vld [vmem:[%s2019_s1] sm:$0xff]   ;;  %v1628_v19 = vmov 0.0   ;;  %v1416_v20 = vld [vmem:[%s2019_s1 + $0x8] sm:$0xff]   ;;  %vm1629_vm2 = vmmov 0   ;;  %s1191_s24 = sshll.u32 %s1603_s16, 3  ;;  %vm585_vm3 = vcmask 261120   ;;  %v812_v6 = vlaneseq }
 0x15b   : > { %1255 = vmatprep.subr.bf16.mxu0 %v1628_v19  ;;  %1263 = vmatprep.subr.bf16.mxu1 %v1628_v19  ;;  %s566_s18 = scalar_lea.vmem %s1862_s20, %s1191_s24  ;;  %vm677_vm4 = vcmask 130048   ;;  %v1417_v41 = vld [vmem:[#allocation4] sm:$0xff]   ;;  %v1418_v42 = vld [vmem:[#allocation4 + $0x8] sm:$0xff]   ;;  %vm998_vm5 = vcmask 125952   ;;  %v1419_v60 = vld [vmem:[#allocation7] sm:$0xff]   ;;  %vm927_vm6 = vcmask 523264  }
 0x15c   : > { %1256 = vmatpush3.bf16.msra.mxu0 %v1415_v18  ;;  %1259 = vmatprep.mubr.msk.bf16.mxu0 %vm1629_vm2, %v1628_v19  ;;  %v567_v23 = vld [vmem:[%s566_s18] sm:$0xff]  ;;  %v1420_v61 = vld [vmem:[#allocation7 + $0x8] sm:$0xff]   ;;  %v1933_v8 = vshrl.u32 %v812_v6, 7  ;;  %v1936_v10 = vld [vmem:[#allocation9] sm:$0x1f]  ;;  %s2064_s30 = sld [smem:[#allocation20_spill]] }
 0x15d   : > { %1257 = vmatprep.subr.bf16.mxu0 %v1628_v19  ;;  %1265 = vmatprep.mubr.msk.bf16.mxu1 %vm1629_vm2, %v1628_v19  ;;  %v568_v24 = vpack.c.bf16 %v567_v23, %v567_v23  ;;  %v1421_v62 = vld [vmem:[%s2025_s7] sm:$0xff]   ;;  %v1422_v63 = vld [vmem:[%s2025_s7 + $0x8] sm:$0xff]   ;;  %s1210_s21 = sshll.u32 %s1607_s17, 1  ;;  %s1027_s20 = sshll.u32 %s421_s29, 4  ;;  %s1028_s20 = int_to_ptr.vmem [resolvable:$true] %s1027_s20 }
 0x15e   : > { %v814_v9 = vsub.s32 1, %v1933_v8  ;;  %v819_v11 = vsub.s32 2, %v1933_v8  ;;  %s1023_s24 = sadd.s32 %s1603_s16, %s1210_s21  ;;  %s2065_s11 = sld [smem:[#allocation24_spill]] }
 0x15f   : > { %v630_v21 = vld [vmem:[#allocation2] sm:$0xff]  ;;  %s1211_s18 = sshll.u32 %s1023_s24, 6  ;;  %s1009_s15 = scalar_lea.sflag [#allocation6], %s419_s23 }
 0x160   : > { %v635_v22 = vsel %vm585_vm3, %v630_v21, 0  ;;  %1258 = vmatpush3.bf16.msra.mxu0 %v1416_v20  ;;  %v690_v40 = vld [vmem:[#allocation3] sm:$0xff]  ;;  %v815_v13 = vrot.slane %v1936_v10, %v814_v9  ;;  %v820_v16 = vrot.slane %v1936_v10, %v819_v11  ;;  %v1423_v21 = vld [vmem:[%s2025_s7 + $0x10] sm:$0xff]   ;;  %s1517_s10 = scalar_lea.vmem %s1028_s20, 64  ;;  %s1630_s13 = smov [#allocation10]  }
 0x161   : > { %1264 = vmatpush3.bf16.xpose.msra.mxu1 %v635_v22  ;;  %1269 = vmatprep.subr.bf16.mxu0 %v1628_v19  ;;  %v1424_v22 = vld [vmem:[%s2025_s7 + $0x18] sm:$0xff]   ;;  %p1518_p12 = scmp.ne.s32.totalorder %s1028_s20, %s1517_s10  ;;  %s1521_s12 = sshll.u32 %s1630_s13, 4  ;;  %s1522_s12 = int_to_ptr.vmem [resolvable:$false] %s1521_s12 }
 0x162   : > { %1275 = vmatprep.subr.bf16.mxu1 %v1628_v19  ;;  %p2066_p1 = scmp.ne.s32.totalorder %s2064_s30, 0  ;;  %s1523_s16 = scalar_lea.vmem %s1522_s12, 128 }
 0x163   : > { %1260 = vmatmul.mubr.msk.bf16.vlgmr.msra.gmra.mrb[0].mxu0 %vm585_vm3, %v568_v24  ;;  %p1524_p6 = scmp.lt.s32.totalorder %s1028_s20, %s1522_s12  ;;  %p1525_p7 = scmp.lt.s32.totalorder %s1523_s16, %s1517_s10 }
 0x164   : > { %1271 = vmatprep.mubr.msk.bf16.mxu0 %vm1629_vm2, %v1628_v19  ;;  %1270 = vmatpush3.bf16.msra.mxu0 %v690_v40  ;;  %s1963_s25 = scalar_lea.hbm %s2065_s11, %s1211_s18  ;;  %p1519_p4 = pnand %p1518_p12, %p2066_p1 }
 0x165   : > { %1283 = vmatprep.subr.bf16.mxu0 %v1628_v19  ;;  %p1526_p9 = por %p1525_p7, %p1524_p6 }
 0x166   : > { %p1520_p5 = pneg %p1519_p4 }
 0x168   : > { %p1527_p11 = pnand %p1526_p9, %p1520_p5 }
 0x236   : > { %v623_v25 = vpop.f32.mrb[0].mxu0 }
 0x237   : > { %v629_v26 = vpack.c.bf16 %v623_v25, %v623_v25  ;;  %v1261_v27 = vpop.f32.mrb[1].mxu0 }
 0x238   : > { %v626_v28 = vpop.f32.mrb[2].mxu0 }
 0x239   : > { %v1262_v29 = vpop.f32.mrb[3].mxu0  ;;  %1266 = vmatmul.mubr.msk.bf16.vlgmr.msra.gmra.mrb[0].mxu1 %vm585_vm3, %v629_v26 }
 0x23a   : > { %1279 = vmatprep.mubr.msk.bf16.mxu1 %vm1629_vm2, %v1628_v19  ;;  %1276 = vmatpush3.bf16.msra.mxu1 %v1417_v41 }
 0x23b   : > { %1277 = vmatprep.subr.bf16.mxu1 %v1628_v19 }
 0x23e   : > { %1278 = vmatpush3.bf16.msra.mxu1 %v1418_v42 }
 0x23f   : > { %1291 = vmatprep.subr.bf16.mxu1 %v1628_v19 }
 0x30c   : > { %v671_v30 = vpop.f32.mrb[0].mxu1 }
 0x30d   : > { %v1267_v31 = vpop.f32.mrb[1].mxu1  ;;  %v678_v32 = vsel %vm677_vm4, %v671_v30, -inf }
 0x30e   : > { %679 = vmax.xlane.f32.xlu0 %v678_v32  ;;  %v674_v33 = vpop.f32.mrb[2].mxu1 }
 0x30f   : > { %v1268_v34 = vpop.f32.mrb[3].mxu1 }
 0x39b   : > { %v680_v35 = vpop.xlane.xlu0 %679 }
 0x39c   : > { %v681_v36 = vsub.f32 %v671_v30, %v680_v35 }
 0x39e   : > { %v682_v37 = vmul.f32 1.442695, %v681_v36 }
 0x3a0   : > { %1425 = vpow2.f32 %v682_v37 }
 0x3aa   : > { %v1426_v38 = vpop.eup %1425 }
 0x3ab   : > { %v684_v39 = vsel %vm677_vm4, %v1426_v38, 0.0 }
 0x3ac   : > { %685 = vadd.xlane.f32.xlu0 %v684_v39 }
 0x439   : > { %v686_v43 = vpop.xlane.xlu0 %685 }
 0x43a   : > { %1427 = vrcp.f32 %v686_v43 }
 0x444   : > { %v1428_v44 = vpop.eup %1427 }
 0x445   : > { %v688_v45 = vmul.f32 %v1428_v44, %v1426_v38 }
 0x447   : > { %v689_v46 = vpack.c.bf16 %v688_v45, %v688_v45 }
 0x449   : > { %1272 = vmatmul.mubr.msk.bf16.vlgmr.msra.gmra.mrb[4].mxu0 %vm677_vm4, %v689_v46  ;;  %999 = vst.msk [vmem:[%s421_s29] sm:$0xf] %vm998_vm5, %v689_v46 }
 0x44a   : > { %1287 = vmatprep.mubr.msk.bf16.mxu0 %vm1629_vm2, %v1628_v19  ;;  %1284 = vmatpush3.bf16.msra.mxu0 %v1419_v60 }
 0x44b   : > { %1285 = vmatprep.subr.bf16.mxu0 %v1628_v19 }
 0x44e   : > { %1286 = vmatpush3.bf16.msra.mxu0 %v1420_v61 }
 0x51c   : > { %v728_v47 = vpop.f32.mrb[4].mxu0 }
 0x51d   : > { %v734_v48 = vpack.c.bf16 %v728_v47, %v728_v47  ;;  %v1273_v49 = vpop.f32.mrb[5].mxu0 }
 0x51e   : > { %v731_v50 = vpop.f32.mrb[6].mxu0 }
 0x51f   : > { %v1274_v51 = vpop.f32.mrb[7].mxu0  ;;  %1280 = vmatmul.mubr.msk.bf16.vlgmr.msra.gmra.mrb[4].mxu1 %vm585_vm3, %v734_v48 }
 0x520   : > { %1299 = vmatprep.mubr.msk.bf16.mxu1 %vm1629_vm2, %v1628_v19  ;;  %1292 = vmatpush3.bf16.msra.mxu1 %v1421_v62 }
 0x521   : > { %1293 = vmatprep.subr.bf16.mxu1 %v1628_v19 }
 0x524   : > { %1294 = vmatpush3.bf16.msra.mxu1 %v1422_v63 }
 0x525   : > { %1295 = vmatprep.subr.bf16.mxu1 %v1628_v19 }
 0x528   : > { %1296 = vmatpush3.bf16.msra.mxu1 %v1423_v21 }
 0x529   : > { %1297 = vmatprep.subr.bf16.mxu1 %v1628_v19  ;;  %v901_v19 = vsub.s32 0, %v1933_v8 }
 0x52b   : > { %v902_v31 = vrot.slane %v1936_v10, %v901_v19 }
 0x52c   : > { %1298 = vmatpush3.bf16.msra.mxu1 %v1424_v22 }
 0x5f2   : > { %v788_v52 = vpop.f32.mrb[4].mxu1 }
 0x5f3   : > { %v795_v53 = vadd.f32 %v788_v52, %v567_v23  ;;  %v1281_v54 = vpop.f32.mrb[5].mxu1  ;;  %v1200_v23 = vld [vmem:[%s2024_s6] ss:$0 sm:$0xff] }
 0x5f4   : > { %v791_v55 = vpop.f32.mrb[6].mxu1 }
 0x5f5   : > { %v1282_v56 = vpop.f32.mrb[7].mxu1  ;;  %v796_v57 = vsel %vm585_vm3, %v795_v53, 0.0  ;;  %v801_v58 = vmul.f32 %v795_v53, %v795_v53 }
 0x5f6   : > { %797 = vadd.xlane.f32.xlu1 %v796_v57 }
 0x5f7   : > { %v802_v59 = vsel %vm585_vm3, %v801_v58, 0.0 }
 0x5fa   : > { %803 = vadd.xlane.f32.xlu1 %v802_v59 }
 0x683   : > { %v798_v0 = vpop.xlane.xlu1 %797 }
 0x684   : > { %v800_v1 = vmul.f32 0.03125, %v798_v0 }
 0x686   : > { %v806_v3 = vmul.f32 %v800_v1, %v800_v1  ;;  %v808_v12 = vsub.f32 %v795_v53, %v800_v1 }
 0x687   : > { %v804_v2 = vpop.xlane.xlu1 %803 }
 0x688   : > { %v805_v4 = vmul.f32 0.03125, %v804_v2 }
 0x68a   : > { %v807_v5 = vsub.f32 %v805_v4, %v806_v3 }
 0x68c   : > { %v809_v7 = vadd.f32 1e-05, %v807_v5 }
 0x68e   : > { %1429 = vrsqrt.f32 %v809_v7 }
 0x698   : > { %v1430_v14 = vpop.eup %1429 }
 0x699   : > { %v811_v15 = vmul.f32 %v1430_v14, %v808_v12 }
 0x69b   : > { %v816_v17 = vmul.f32 %v815_v13, %v811_v15 }
 0x69d   : > { %v821_v18 = vadd.f32 %v820_v16, %v816_v17 }
 0x69f   : > { %v822_v20 = vpack.c.bf16 %v821_v18, %v821_v18 }
 0x6a1   : > { %1288 = vmatmul.mubr.msk.bf16.vlgmr.msra.gmra.mrb[8].mxu0 %vm585_vm3, %v822_v20 }
 0x774   : > { %v883_v24 = vpop.f32.mrb[8].mxu0 }
 0x775   : > { %v884_v25 = vadd.f32 %v1200_v23, %v883_v24  ;;  %v1289_v26 = vpop.f32.mrb[9].mxu0 }
 0x776   : > { %v886_v27 = vpop.f32.mrb[10].mxu0 }
 0x777   : > { %v889_v28 = vmax.f32 %v884_v25, 0.0  ;;  %v1290_v29 = vpop.f32.mrb[11].mxu0 }
 0x779   : > { %v890_v30 = vpack.c.bf16 %v889_v28, %v889_v28 }
 0x77b   : > { %1300 = vmatmul.mubr.msk.bf16.vlgmr.msra.gmra.mrb[8].mxu1 %vm927_vm6, %v890_v30 }
 0x84e   : > { %v965_v32 = vpop.f32.mrb[8].mxu1 }
 0x84f   : > { %v966_v33 = vadd.f32 %v965_v32, %v902_v31  ;;  %v1301_v34 = vpop.f32.mrb[9].mxu1 }
 0x850   : > { %v968_v35 = vpop.f32.mrb[10].mxu1 }
 0x851   : > { %v971_v36 = vadd.f32 %v966_v33, %v821_v18  ;;  %v1302_v37 = vpop.f32.mrb[11].mxu1 }
 0x853   : > { %v972_v38 = vsel %vm585_vm3, %v971_v36, 0.0  ;;  %v976_v39 = vmul.f32 %v971_v36, %v971_v36 }
 0x854   : > { %973 = vadd.xlane.f32.xlu0 %v972_v38 }
 0x855   : > { %v977_v40 = vsel %vm585_vm3, %v976_v39, 0.0 }
 0x856   : > { %978 = vadd.xlane.f32.xlu1 %v977_v40 }
 0x857   : > { %1530 = shalt.err (!%p1527_p11)
}
 0x858   : > { %s1531_s17 = scalar_lea.hbm %s1963_s25, 64  ;;  %s1535_s29 = scalar_lea.hbm %s2065_s11, 256 }
 0x859   : > { %p1532_p13 = scmp.ne.s32.totalorder %s1963_s25, %s1531_s17  ;;  %p1536_p0 = scmp.lt.u32.totalorder %s1963_s25, %s2065_s11 }
 0x85a   : > { %p1537_p2 = scmp.lt.u32.totalorder %s1535_s29, %s1531_s17  ;;  %p1539_p12 = scmp.lt.u32.totalorder %s1531_s17, %s1963_s25 }
 0x85b   : > { %p1533_p3 = pnand %p1532_p13, %p2066_p1 }
 0x85c   : > { %p1538_p10 = por %p1537_p2, %p1536_p0 }
 0x85d   : > { %p1534_p8 = pneg %p1533_p3 }
 0x85e   : > { %p1540_p4 = por %p1539_p12, %p1538_p10 }
 0x860   : > { %p1541_p5 = pnand %p1540_p4, %p1534_p8 }
 0x862   : > { %1544 = shalt.err (!%p1541_p5)
}
 0x863   : > { %1315 = dma.vmem_to_hbm [thread:$0]  (%p2066_p1), %s1028_s20, 64, %s1963_s25, %s1009_s15   ;;  %v989_v48 = vsub.s32 3, %v1933_v8  ;;  %v994_v49 = vsub.s32 4, %v1933_v8 }
 0x865   : > { %v990_v51 = vrot.slane %v1936_v10, %v989_v48  ;;  %v995_v53 = vrot.slane %v1936_v10, %v994_v49 }
 0x8e1   : > { %v974_v41 = vpop.xlane.xlu0 %973 }
 0x8e2   : > { %v975_v42 = vmul.f32 0.03125, %v974_v41 }
 0x8e3   : > { %v979_v43 = vpop.xlane.xlu1 %978 }
 0x8e4   : > { %v981_v44 = vmul.f32 %v975_v42, %v975_v42  ;;  %v980_v45 = vmul.f32 0.03125, %v979_v43  ;;  %v983_v50 = vsub.f32 %v971_v36, %v975_v42 }
 0x8e6   : > { %v982_v46 = vsub.f32 %v980_v45, %v981_v44 }
 0x8e8   : > { %v984_v47 = vadd.f32 1e-05, %v982_v46 }
 0x8ea   : > { %1431 = vrsqrt.f32 %v984_v47 }
 0x8f4   : > { %v1432_v52 = vpop.eup %1431 }
 0x8f5   : > { %v986_v54 = vmul.f32 %v1432_v52, %v983_v50 }
 0x8f7   : > { %v991_v55 = vmul.f32 %v990_v51, %v986_v54 }
 0x8f9   : > { %v996_v56 = vadd.f32 %v995_v53, %v991_v55 }
 0x8fb   : > { %997 = vst.msk [vmem:[%s1867_s22] sm:$0xff] %vm585_vm3, %v996_v56 }
 0x8fc PF: > { %s2067_s30 = sld [smem:[#allocation18_spill]]  ;;  %s2068_s24 = sld [smem:[#allocation14_spill]] }
 0x8fd   : > { %s2069_s18 = sld [smem:[#allocation22_spill]] }
 0x902   : > { %p1337_p1 = scmp.ge.s32.totalorder %s2067_s30, 2  ;;  %s1050_s20 = sand.u32 1, %s2068_s24  }
 0x903   : > { %p2070_p6 = scmp.ne.s32.totalorder %s2069_s18, 0  ;;  %s1051_s19 = scalar_lea.sflag [#allocation6], %s1050_s20 }
 0x905   : > { %p1328_p7 = pnand %p1337_p1, %p2070_p6 }
 0x907   : > { %1586 = dma.done.wait (!%p1328_p7), %s1051_s19, 64  }
 0x908   : > { %1588 = vsyncadd (!%p1328_p7), %s1051_s19, 4294967232  ;;  %s26_s20 = sadd.s32 1, %s2067_s30   ;;  %s2071_s26 = sld [smem:[#allocation15_spill]] }
 0x909   : > { %p23_p9 = scmp.ge.s32.totalorder %s26_s20, 6   ;;  %s2072_s15 = sld [smem:[#allocation23_spill]] }
 0x90a   : > { %s2073_s16 = sld [smem:[#allocation16_spill]]  ;;  %s2074_s17 = sld [smem:[#allocation17_spill]] }
 0x90b   : > { %s2075_s18 = sld [smem:[#allocation19_spill]]  ;;  %s2076_s19 = sld [smem:[#allocation21_spill]] }
 0x90c   : > { %s2077_s13 = smov %s1595_s14  ;;  %25 = sbr.rel (!%p23_p9) target bundleno = 9 (0x9), region = 121 }
 0x90e   : > { %s2078_s14 = smov %s2071_s26 }
 0x913   :  { %1056 = vsyncpa [#allocation5], 1 }
 0x914   :  { %1058 = vsyncpa [#allocation5 + $0x1], 1 }
 0x915   :  { %1059 = vsyncpa [#allocation8], 1 }
 0x916   :  { %1060 = vsyncpa [#allocation6], 1 }
 0x917   :  { %1062 = vsyncpa [#allocation6 + $0x1], 1 }

// kernel: fwd.3
= control target key start
LH: loop header
LB: loop body
LE: loop exit
PB: predicated region body
PF: predicated region fallthrough
CT: control target
= control target key end

     0   :  { %s1664_s0 = inlined_call_operand.vmem [shape: f32[2,8,32], index: 0, kind: input, shape index: {}]   ;;  %s1665_s1 = inlined_call_operand.vmem [shape: bf16[32,32], index: 1, kind: input, shape index: {}]   ;;  %s1666_s2 = inlined_call_operand.vmem [shape: bf16[32,32], index: 2, kind: input, shape index: {}]   ;;  %s1667_s3 = inlined_call_operand.vmem [shape: bf16[32,32], index: 3, kind: input, shape index: {}]   ;;  %s1668_s4 = inlined_call_operand.vmem [shape: bf16[32,32], index: 4, kind: input, shape index: {}]   ;;  %s1669_s5 = inlined_call_operand.vmem [shape: bf16[32,64], index: 5, kind: input, shape index: {}]   ;;  %s1670_s6 = inlined_call_operand.vmem [shape: f32[1,64], index: 6, kind: input, shape index: {}]   ;;  %s1671_s7 = inlined_call_operand.vmem [shape: bf16[64,32], index: 7, kind: input, shape index: {}]   ;;  %s1672_s8 = inlined_call_operand.vmem [shape: f32[5,32], index: 8, kind: input, shape index: {}]   ;;  %s1673_s9 = inlined_call_operand.vmem [shape: f32[2,8,32], index: 9, kind: output, shape index: {0}]   ;;  %s1674_s10 = inlined_call_operand.hbm [shape: bf16[2,8,8], index: 10, kind: output, shape index: {1}]  }
   0x1   :  { %1678 = sst [smem:[#allocation7_spill]] %s1664_s0 }
   0x2   :  { %1679 = sst [smem:[#allocation8_spill]] %s1665_s1 }
   0x3   :  { %1680 = sst [smem:[#allocation9_spill]] %s1666_s2 }
   0x4   :  { %1681 = sst [smem:[#allocation10_spill]] %s1667_s3 }
   0x5   :  { %16 = vsyncpa [#allocation5], 0 }
   0x6   :  { %18 = vsyncpa [#allocation5 + $0x1], 0  ;;  %s1421_s13 = smov 0   ;;  %s1423_s14 = smov 0  }
   0x7   :  { %s1425_s15 = smov 0   ;;  %s1427_s16 = smov 0  }
   0x8   :  { %s1429_s17 = smov 0   ;;  %s1431_s18 = smov 0  }
   0x9 LB: > { %s1081_s19 = sadd.s32 4294967295, %s1361_s18   ;;  %s1082_s20 = sadd.s32 4294967294, %s1361_s18   ;;  %s1361_s18 = sphi %s1431_s18, %s24_s18   ;;  %s1357_s17 = sphi %s1429_s17, %s1695_s17   ;;  %s1353_s16 = sphi %s1427_s16, %s1694_s16   ;;  %s1349_s15 = sphi %s1425_s15, %s1693_s15   ;;  %s1345_s14 = sphi %s1423_s14, %s1692_s14   ;;  %s1341_s13 = sphi %s1421_s13, %s1691_s13  }
   0xa   : > { %s36_s21 = sadd.s32 1, %s1357_s17  ;;  %s267_s22 = sadd.s32 1, %s1349_s15 }
   0xb   : > { %p38_p0 = scmp.ge.s32.totalorder %s36_s21, 2  ;;  %p277_p1 = scmp.ne.s32.totalorder %s1349_s15, %s1345_s14 }
   0xc   : > { %p278_p2 = scmp.eq.s32.totalorder %s1081_s19, 1  ;;  %p283_p3 = scmp.ne.s32.totalorder %s1345_s14, %s1341_s13 }
   0xd   : > { %s1697_s21 = smov (%p38_p0, %s36_s21), 0  ;;  %p284_p5 = scmp.eq.s32.totalorder %s1082_s20, 1 }
   0xe   : > { %p1461_p4 = por %p278_p2, %p277_p1  ;;  %s262_s24 = ssub.s32 %s1357_s17, %s1697_s21 }
   0xf   : > { %p1085_p6 = scmp.ge.s32.totalorder %s1361_s18, 1  ;;  %p265_p7 = scmp.eq.s32.totalorder %s262_s24, 0 }
  0x10   : > { %p1468_p8 = por %p284_p5, %p283_p3  ;;  %p333_p9 = scmp.lt.s32.totalorder %s1361_s18, 3 }
  0x11   : > { %s1474_s26 = scalar_select %p265_p7, %s1349_s15, %s267_s22  }
  0x12   : > { %p334_p10 = pnand %p1085_p6, %p333_p9 }
  0x13   : > { %s1684_s2 = sld [smem:[#allocation9_spill]] (!%p334_p10)  ;;  %v1363_v1 = vmov (!%p334_p10), 0.0   ;;  %vm1364_vm0 = vmmov (!%p334_p10), 0   ;;  %p377_p11 = scmp.lt.s32.totalorder (!%p334_p10), %s1353_s16, 1  ;;  %vm411_vm1 = vcmask (!%p334_p10), 261120   ;;  %vm512_vm2 = vcmask (!%p334_p10), 257024  }
  0x14   : > { %337 = sbr.rel (%p334_p10) target bundleno = 1995 (0x7cb), region = 56  ;;  %1140 = vmatprep.subr.bf16.mxu0 (!%p334_p10), %v1363_v1  ;;  %1148 = vmatprep.subr.bf16.mxu1 (!%p334_p10), %v1363_v1  ;;  %s1685_s3 = sld [smem:[#allocation10_spill]] (!%p334_p10)  ;;  %vm645_vm3 = vcmask (!%p334_p10), 1043456   ;;  %vm628_vm4 = vcmask (!%p334_p10), 64512   ;;  %v1267_v38 = vld [vmem:[%s1668_s4] sm:$0xff] (!%p334_p10)   ;;  %vm953_vm5 = vcmask (!%p334_p10), 60416  }
  0x15   : > { %1144 = vmatprep.mubr.msk.bf16.mxu0 (!%p334_p10), %vm1364_vm0, %v1363_v1  ;;  %1152 = vmatprep.mubr.msk.bf16.mxu1 (!%p334_p10), %vm1364_vm0, %v1363_v1  ;;  %s1686_s1 = sld [smem:[#allocation8_spill]] (!%p334_p10)  ;;  %s1687_s0 = sld [smem:[#allocation7_spill]] (!%p334_p10)  ;;  %v1268_v43 = vld [vmem:[%s1668_s4 + $0x8] sm:$0xff] (!%p334_p10)   ;;  %v1269_v57 = vld [vmem:[%s1669_s5] sm:$0xff] (!%p334_p10)   ;;  %vm882_vm6 = vcmask (!%p334_p10), 523264  }
  0x16   : > { %s1676_s28 = sand.u32 (!%p334_p10), 1, %s1345_s14   ;;  %v1270_v58 = vld [vmem:[%s1669_s5 + $0x8] sm:$0xff] (!%p334_p10)   ;;  %v1271_v59 = vld [vmem:[%s1671_s7] sm:$0xff] (!%p334_p10)   ;;  %s1689_s12 = sand.u32 (!%p334_p10), 1, %s1345_s14  }
  0x17   : > { %v1272_v60 = vld [vmem:[%s1671_s7 + $0x8] sm:$0xff] (!%p334_p10)   ;;  %s963_s19 = scalar_lea.sflag (!%p334_p10), [#allocation5], %s1689_s12 }
  0x19   : > { %v1261_v0 = vld [vmem:[%s1684_s2] sm:$0xff] (!%p334_p10)   ;;  %v1262_v2 = vld [vmem:[%s1684_s2 + $0x8] sm:$0xff] (!%p334_p10)  }
  0x1a   : > { %1141 = vmatpush3.bf16.msra.mxu0 (!%p334_p10), %v1261_v0  ;;  %v1265_v3 = vld [vmem:[%s1685_s3] sm:$0xff] (!%p334_p10)   ;;  %v1266_v8 = vld [vmem:[%s1685_s3 + $0x8] sm:$0xff] (!%p334_p10)  }
  0x1b   : > { %1142 = vmatprep.subr.bf16.mxu0 %v1363_v1  ;;  %s1491_s11 = scalar_select %p377_p11, %s1353_s16, 1  ;;  %v1263_v4 = vld [vmem:[%s1686_s1] sm:$0xff]   ;;  %1149 = vmatpush3.bf16.msra.mxu1 %v1265_v3  ;;  %v1264_v7 = vld [vmem:[%s1686_s1 + $0x8] sm:$0xff]  }
  0x1c   : > { %1150 = vmatprep.subr.bf16.mxu1 %v1363_v1  ;;  %s1365_s1 = smov [#allocation4]  }
  0x1d   : > { %s1675_s20 = sshll.u32 %s1491_s11, 3  ;;  %s1287_s2 = sshll.u32 %s1365_s1, 4  ;;  %s1288_s2 = int_to_ptr.vmem [resolvable:$false] %s1287_s2 }
  0x1e   : > { %1143 = vmatpush3.bf16.msra.mxu0 %v1262_v2  ;;  %s380_s29 = scalar_lea.vmem %s1687_s0, %s1675_s20  ;;  %s1113_s20 = sshll.u32 %s1353_s16, 6 }
  0x1f   : > { %1156 = vmatprep.subr.bf16.mxu0 %v1363_v1  ;;  %v1506_v5 = vld [vmem:[%s380_s29] sm:$0xff]  ;;  %1151 = vmatpush3.bf16.msra.mxu1 %v1266_v8  ;;  %s1546_s29 = sshll.u32 %s1676_s28, 2  ;;  %s1611_s27 = scalar_lea.hbm %s1674_s10, %s1113_s20 }
  0x20   : > { %v394_v6 = vpack.c.bf16 %v1506_v5, %v1506_v5  ;;  %1164 = vmatprep.subr.bf16.mxu1 %v1363_v1  ;;  %s1677_s30 = scalar_lea.vmem [#allocation4], %s1546_s29  ;;  %v1585_v8 = vld [vmem:[%s1672_s8] sm:$0x1f]  ;;  %s1688_s28 = scalar_lea.vmem [#allocation4], %s1546_s29 }
  0x21   : > { %s1289_s3 = scalar_lea.vmem %s1288_s2, 128 }
  0x22   : > { %1145 = vmatmul.mubr.msk.bf16.vlgmr.msra.gmra.mrb[0].mxu0 %vm411_vm1, %v394_v6  ;;  %1153 = vmatmul.mubr.msk.bf16.vlgmr.msra.gmra.mrb[0].mxu1 %vm411_vm1, %v394_v6 }
  0x23   : > { %1157 = vmatpush3.bf16.msra.mxu0 %v1263_v4  ;;  %1160 = vmatprep.mubr.msk.bf16.mxu0 %vm1364_vm0, %v1363_v1  ;;  %v767_v4 = vlaneseq }
  0x24   : > { %1158 = vmatprep.subr.bf16.mxu0 %v1363_v1  ;;  %1166 = vmatprep.mubr.msk.bf16.mxu1 %vm1364_vm0, %v1363_v1 }
  0x27   : > { %1159 = vmatpush3.bf16.msra.mxu0 %v1264_v7 }
  0x28   : > { %1170 = vmatprep.subr.bf16.mxu0 %v1363_v1 }
  0x2a   : > { %1161 = vmatmul.mubr.msk.bf16.vlgmr.msra.gmra.mrb[4].mxu0 %vm411_vm1, %v394_v6  ;;  %v1579_v6 = vshrl.u32 %v767_v4, 7 }
  0x2b   : > { %1172 = vmatprep.mubr.msk.bf16.mxu0 %vm1364_vm0, %v1363_v1 }
  0x2c   : > { %v769_v7 = vsub.s32 1, %v1579_v6 }
  0xf5   : > { %v449_v9 = vpop.f32.mrb[0].mxu0  ;;  %v505_v21 = vpop.f32.mrb[0].mxu1 }
  0xf6   : > { %v511_v10 = vpack.c.bf16 %v449_v9, %v449_v9  ;;  %v1146_v11 = vpop.f32.mrb[1].mxu0  ;;  %v514_v22 = vpack.c.bf16 %v505_v21, %v505_v21  ;;  %v1154_v23 = vpop.f32.mrb[1].mxu1  ;;  %v774_v9 = vsub.s32 2, %v1579_v6 }
  0xf7   : > { %v452_v12 = vpop.f32.mrb[2].mxu0  ;;  %v508_v24 = vpop.f32.mrb[2].mxu1  ;;  %v770_v11 = vrot.slane %v1585_v8, %v769_v7 }
  0xf8   : > { %513 = vst.msk [vmem:[#allocation2] sm:$0xf] %vm512_vm2, %v511_v10  ;;  %v1147_v13 = vpop.f32.mrb[3].mxu0  ;;  %515 = vst.msk [vmem:[#allocation3] sm:$0xf] %vm512_vm2, %v514_v22  ;;  %v1155_v25 = vpop.f32.mrb[3].mxu1 }
  0xfd   : > { %v574_v14 = vpop.f32.mrb[4].mxu0 }
  0xfe   : > { %v1162_v15 = vpop.f32.mrb[5].mxu0  ;;  %v580_v20 = vpack.c.bf16 %v574_v14, %v574_v14  ;;  %v775_v14 = vrot.slane %v1585_v8, %v774_v9 }
  0xff   : > { %v581_v16 = vld [vmem:[#allocation2] sm:$0xf]  ;;  %v577_v17 = vpop.f32.mrb[6].mxu0  ;;  %v641_v26 = vld [vmem:[#allocation3] sm:$0xf] }
 0x100   : > { %v586_v18 = vsel %vm411_vm1, %v581_v16, 0  ;;  %v1163_v19 = vpop.f32.mrb[7].mxu0  ;;  %v647_v27 = vsel %vm645_vm3, %v641_v26, 0 }
 0x101   : > { %1165 = vmatpush3.bf16.xpose.msra.mxu1 %v586_v18  ;;  %1171 = vmatpush3.bf16.msra.mxu0 %v647_v27  ;;  %v1273_v18 = vld [vmem:[%s1671_s7 + $0x10] sm:$0xff]   ;;  %v1274_v19 = vld [vmem:[%s1671_s7 + $0x18] sm:$0xff]  }
 0x102   : > { %1176 = vmatprep.subr.bf16.mxu1 %v1363_v1  ;;  %1184 = vmatprep.subr.bf16.mxu0 %v1363_v1 }
 0x108   : > { %1167 = vmatmul.mubr.msk.bf16.vlgmr.msra.gmra.mrb[4].mxu1 %vm411_vm1, %v580_v20  ;;  %v1103_v20 = vld [vmem:[%s1670_s6] ss:$0 sm:$0xff] }
 0x109   : > { %1180 = vmatprep.mubr.msk.bf16.mxu1 %vm1364_vm0, %v1363_v1  ;;  %1177 = vmatpush3.bf16.msra.mxu1 %v1267_v38 }
 0x10a   : > { %1178 = vmatprep.subr.bf16.mxu1 %v1363_v1 }
 0x10d   : > { %1179 = vmatpush3.bf16.msra.mxu1 %v1268_v43 }
 0x10e   : > { %1192 = vmatprep.subr.bf16.mxu1 %v1363_v1 }
 0x1db   : > { %v622_v28 = vpop.f32.mrb[4].mxu1 }
 0x1dc   : > { %v1168_v29 = vpop.f32.mrb[5].mxu1  ;;  %v629_v30 = vsel %vm628_vm4, %v622_v28, -inf }
 0x1dd   : > { %630 = vmax.xlane.f32.xlu0 %v629_v30  ;;  %v625_v31 = vpop.f32.mrb[6].mxu1 }
 0x1de   : > { %v1169_v32 = vpop.f32.mrb[7].mxu1 }
 0x26a   : > { %v631_v33 = vpop.xlane.xlu0 %630 }
 0x26b   : > { %v632_v34 = vsub.f32 %v622_v28, %v631_v33 }
 0x26d   : > { %v633_v35 = vmul.f32 1.442695, %v632_v34 }
 0x26f   : > { %1275 = vpow2.f32 %v633_v35 }
 0x279   : > { %v1276_v36 = vpop.eup %1275 }
 0x27a   : > { %v635_v37 = vsel %vm628_vm4, %v1276_v36, 0.0 }
 0x27b   : > { %636 = vadd.xlane.f32.xlu0 %v635_v37 }
 0x308   : > { %v637_v39 = vpop.xlane.xlu0 %636 }
 0x309   : > { %1277 = vrcp.f32 %v637_v39 }
 0x313   : > { %v1278_v40 = vpop.eup %1277 }
 0x314   : > { %v639_v41 = vmul.f32 %v1278_v40, %v1276_v36 }
 0x316   : > { %v640_v42 = vpack.c.bf16 %v639_v41, %v639_v41 }
 0x318   : > { %1173 = vmatmul.mubr.msk.bf16.vlgmr.msra.gmra.mrb[8].mxu0 %vm628_vm4, %v640_v42  ;;  %954 = vst.msk [vmem:[%s1677_s30] sm:$0xf] %vm953_vm5, %v640_v42  ;;  %s980_s30 = sshll.u32 %s1688_s28, 4  ;;  %s981_s30 = int_to_ptr.vmem [resolvable:$true] %s980_s30 }
 0x319   : > { %1188 = vmatprep.mubr.msk.bf16.mxu0 %vm1364_vm0, %v1363_v1  ;;  %1185 = vmatpush3.bf16.msra.mxu0 %v1269_v57  ;;  %s1283_s0 = scalar_lea.vmem %s981_s30, 64  ;;  %p1290_p1 = scmp.lt.s32.totalorder %s981_s30, %s1288_s2 }
 0x31a   : > { %1186 = vmatprep.subr.bf16.mxu0 %v1363_v1  ;;  %p1284_p12 = scmp.ne.s32.totalorder %s981_s30, %s1283_s0  ;;  %p1291_p2 = scmp.lt.s32.totalorder %s1289_s3, %s1283_s0 }
 0x31c   : > { %p1285_p13 = pnand %p1284_p12, %p1461_p4  ;;  %p1292_p3 = por %p1291_p2, %p1290_p1 }
 0x31d   : > { %1187 = vmatpush3.bf16.msra.mxu0 %v1270_v58 }
 0x31e   : > { %p1286_p0 = pneg %p1285_p13 }
 0x320   : > { %p1293_p5 = pnand %p1292_p3, %p1286_p0 }
 0x3eb   : > { %v683_v44 = vpop.f32.mrb[8].mxu0 }
 0x3ec   : > { %v689_v45 = vpack.c.bf16 %v683_v44, %v683_v44  ;;  %v1174_v46 = vpop.f32.mrb[9].mxu0 }
 0x3ed   : > { %v686_v47 = vpop.f32.mrb[10].mxu0 }
 0x3ee   : > { %v1175_v48 = vpop.f32.mrb[11].mxu0  ;;  %1181 = vmatmul.mubr.msk.bf16.vlgmr.msra.gmra.mrb[8].mxu1 %vm411_vm1, %v689_v45 }
 0x3ef   : > { %1200 = vmatprep.mubr.msk.bf16.mxu1 %vm1364_vm0, %v1363_v1  ;;  %1193 = vmatpush3.bf16.msra.mxu1 %v1271_v59 }
 0x3f0   : > { %1194 = vmatprep.subr.bf16.mxu1 %v1363_v1 }
 0x3f3   : > { %1195 = vmatpush3.bf16.msra.mxu1 %v1272_v60 }
 0x3f4   : > { %1196 = vmatprep.subr.bf16.mxu1 %v1363_v1 }
 0x3f7   : > { %1197 = vmatpush3.bf16.msra.mxu1 %v1273_v18 }
 0x3f8   : > { %1198 = vmatprep.subr.bf16.mxu1 %v1363_v1  ;;  %v856_v1 = vsub.s32 0, %v1579_v6 }
 0x3fa   : > { %v857_v28 = vrot.slane %v1585_v8, %v856_v1 }
 0x3fb   : > { %1199 = vmatpush3.bf16.msra.mxu1 %v1274_v19 }
 0x4c1   : > { %v743_v49 = vpop.f32.mrb[8].mxu1 }
 0x4c2   : > { %v750_v50 = vadd.f32 %v743_v49, %v1506_v5  ;;  %v1182_v51 = vpop.f32.mrb[9].mxu1 }
 0x4c3   : > { %v746_v52 = vpop.f32.mrb[10].mxu1 }
 0x4c4   : > { %v1183_v53 = vpop.f32.mrb[11].mxu1  ;;  %v751_v54 = vsel %vm411_vm1, %v750_v50, 0.0  ;;  %v756_v55 = vmul.f32 %v750_v50, %v750_v50 }
 0x4c5   : > { %752 = vadd.xlane.f32.xlu1 %v751_v54 }
 0x4c6   : > { %v757_v56 = vsel %vm411_vm1, %v756_v55, 0.0 }
 0x4c9   : > { %758 = vadd.xlane.f32.xlu1 %v757_v56 }
 0x552   : > { %v753_v61 = vpop.xlane.xlu1 %752 }
 0x553   : > { %v755_v62 = vmul.f32 0.03125, %v753_v61 }
 0x555   : > { %v761_v0 = vmul.f32 %v755_v62, %v755_v62  ;;  %v763_v10 = vsub.f32 %v750_v50, %v755_v62 }
 0x556   : > { %v759_v63 = vpop.xlane.xlu1 %758 }
 0x557   : > { %v760_v2 = vmul.f32 0.03125, %v759_v63 }
 0x559   : > { %v762_v3 = vsub.f32 %v760_v2, %v761_v0 }
 0x55b   : > { %v764_v5 = vadd.f32 1e-05, %v762_v3 }
 0x55d   : > { %1279 = vrsqrt.f32 %v764_v5 }
 0x567   : > { %v1280_v12 = vpop.eup %1279 }
 0x568   : > { %v766_v13 = vmul.f32 %v1280_v12, %v763_v10 }
 0x56a   : > { %v771_v15 = vmul.f32 %v770_v11, %v766_v13 }
 0x56c   : > { %v776_v16 = vadd.f32 %v775_v14, %v771_v15 }
 0x56e   : > { %v777_v17 = vpack.c.bf16 %v776_v16, %v776_v16 }
 0x570   : > { %1189 = vmatmul.mubr.msk.bf16.vlgmr.msra.gmra.mrb[12].mxu0 %vm411_vm1, %v777_v17 }
 0x643   : > { %v838_v21 = vpop.f32.mrb[12].mxu0 }
 0x644   : > { %v839_v22 = vadd.f32 %v1103_v20, %v838_v21  ;;  %v1190_v23 = vpop.f32.mrb[13].mxu0 }
 0x645   : > { %v841_v24 = vpop.f32.mrb[14].mxu0 }
 0x646   : > { %v844_v25 = vmax.f32 %v839_v22, 0.0  ;;  %v1191_v26 = vpop.f32.mrb[15].mxu0 }
 0x648   : > { %v845_v27 = vpack.c.bf16 %v844_v25, %v844_v25 }
 0x64a   : > { %1201 = vmatmul.mubr.msk.bf16.vlgmr.msra.gmra.mrb[12].mxu1 %vm882_vm6, %v845_v27 }
 0x71d   : > { %v920_v29 = vpop.f32.mrb[12].mxu1 }
 0x71e   : > { %v921_v30 = vadd.f32 %v920_v29, %v857_v28  ;;  %v1202_v31 = vpop.f32.mrb[13].mxu1 }
 0x71f   : > { %v923_v32 = vpop.f32.mrb[14].mxu1 }
 0x720   : > { %v926_v33 = vadd.f32 %v921_v30, %v776_v16  ;;  %v1203_v34 = vpop.f32.mrb[15].mxu1 }
 0x722   : > { %v927_v35 = vsel %vm411_vm1, %v926_v33, 0.0  ;;  %v931_v36 = vmul.f32 %v926_v33, %v926_v33 }
 0x723   : > { %928 = vadd.xlane.f32.xlu0 %v927_v35 }
 0x724   : > { %v932_v37 = vsel %vm411_vm1, %v931_v36, 0.0 }
 0x725   : > { %933 = vadd.xlane.f32.xlu1 %v932_v37 }
 0x726   : > { %1296 = shalt.err (!%p1293_p5)
}
 0x727   : > { %s1297_s16 = scalar_lea.hbm %s1611_s27, 64  ;;  %s1301_s1 = scalar_lea.hbm %s1674_s10, 128 }
 0x728   : > { %p1298_p6 = scmp.ne.s32.totalorder %s1611_s27, %s1297_s16  ;;  %p1302_p10 = scmp.lt.u32.totalorder %s1611_s27, %s1674_s10 }
 0x729   : > { %p1303_p11 = scmp.lt.u32.totalorder %s1301_s1, %s1297_s16  ;;  %p1305_p13 = scmp.lt.u32.totalorder %s1297_s16, %s1611_s27 }
 0x72a   : > { %p1299_p7 = pnand %p1298_p6, %p1461_p4 }
 0x72b   : > { %p1304_p12 = por %p1303_p11, %p1302_p10 }
 0x72c   : > { %p1300_p9 = pneg %p1299_p7 }
 0x72d   : > { %p1306_p0 = por %p1305_p13, %p1304_p12 }
 0x72f   : > { %p1307_p1 = pnand %p1306_p0, %p1300_p9 }
 0x731   : > { %1310 = shalt.err (!%p1307_p1)
}
 0x732   : > { %1204 = dma.vmem_to_hbm [thread:$0]  (%p1461_p4), %s981_s30, 64, %s1611_s27, %s963_s19   ;;  %v944_v45 = vsub.s32 3, %v1579_v6  ;;  %v949_v46 = vsub.s32 4, %v1579_v6 }
 0x733   : > { %s1690_s0 = sshll.u32 %s1491_s11, 3 }
 0x734   : > { %v945_v48 = vrot.slane %v1585_v8, %v944_v45  ;;  %v950_v50 = vrot.slane %v1585_v8, %v949_v46  ;;  %s387_s30 = scalar_lea.vmem %s1673_s9, %s1690_s0 }
 0x7b0   : > { %v929_v38 = vpop.xlane.xlu0 %928 }
 0x7b1   : > { %v930_v39 = vmul.f32 0.03125, %v929_v38 }
 0x7b2   : > { %v934_v40 = vpop.xlane.xlu1 %933 }
 0x7b3   : > { %v936_v41 = vmul.f32 %v930_v39, %v930_v39  ;;  %v935_v42 = vmul.f32 0.03125, %v934_v40  ;;  %v938_v47 = vsub.f32 %v926_v33, %v930_v39 }
 0x7b5   : > { %v937_v43 = vsub.f32 %v935_v42, %v936_v41 }
 0x7b7   : > { %v939_v44 = vadd.f32 1e-05, %v937_v43 }
 0x7b9   : > { %1281 = vrsqrt.f32 %v939_v44 }
 0x7c3   : > { %v1282_v49 = vpop.eup %1281 }
 0x7c4   : > { %v941_v51 = vmul.f32 %v1282_v49, %v938_v47 }
 0x7c6   : > { %v946_v52 = vmul.f32 %v945_v48, %v941_v51 }
 0x7c8   : > { %v951_v53 = vadd.f32 %v950_v50, %v946_v52 }
 0x7ca   : > { %952 = vst.msk [vmem:[%s387_s30] sm:$0xff] %vm411_vm1, %v951_v53 }
 0x7cb PF: > { %p1210_p4 = scmp.ge.s32.totalorder %s1361_s18, 2  ;;  %s1002_s22 = sand.u32 1, %s1341_s13  }
 0x7cc   : > { %s1003_s24 = scalar_lea.sflag [#allocation5], %s1002_s22 }
 0x7cd   : > { %p1207_p2 = pnand %p1210_p4, %p1468_p8 }
 0x7cf   : > { %1336 = dma.done.wait (!%p1207_p2), %s1003_s24, 64  }
 0x7d0   : > { %1338 = vsyncadd (!%p1207_p2), %s1003_s24, 4294967232  ;;  %s24_s18 = sadd.s32 1, %s1361_s18   ;;  %s1691_s13 = smov %s1345_s14 }
 0x7d1   : > { %p21_p3 = scmp.ge.s32.totalorder %s24_s18, 4   ;;  %s1692_s14 = smov %s1349_s15 }
 0x7d2   : > { %s1693_s15 = smov %s1474_s26  ;;  %s1694_s16 = smov %s1357_s17 }
 0x7d3   : > { %s1695_s17 = smov %s1697_s21  ;;  %23 = sbr.rel (!%p21_p3) target bundleno = 9 (0x9), region = 108 }
 0x7da   :  { %1008 = vsyncpa [#allocation5], 1 }
 0x7db   :  { %1010 = vsyncpa [#allocation5 + $0x1], 1 }

</bundles_post_ra>
